<compile_context>
chip_gen: v7x
topology: tpu7x:2x2x1
jax: 0.10.0
libtpu: 0.0.40
codegen_flags: <defaults>
</compile_context>

<pallas_src>
import functools

import jax
import jax.numpy as jnp
from jax.experimental import pallas as pl
from jax.experimental.pallas import tpu as pltpu

EPS = 1e-5


def _affine_conv3x3_stats_kernel(x_ref, scale_ref, shift_ref, w_ref,
                                 y_ref, stats_ref, pad_ref, cols_ref,
                                 *, apply_relu):
    """(x*scale+shift [-> ReLU]) -> conv3x3(pad=1, stride=1) -> raw out + BN stats.

    x_ref     : (H, W, Cin)    f32 activation tile (one image)
    scale_ref : (1, Cin)       per-channel scale (ones for the first conv)
    shift_ref : (1, Cin)       per-channel shift (zeros for the first conv)
    w_ref     : (9*Cin, Cout)  conv weight, taps folded into K, bf16
    y_ref     : (H, W, Cout)   raw conv output (f32)
    stats_ref : (2, Cout)      per-image [sum; sum_of_squares] of conv output
    pad_ref   : VMEM (H+2, W+2, Cin) f32 scratch (halo-padded input)
    cols_ref  : VMEM (H*W, 9*Cin)    bf16 scratch (im2col)
    """
    H, W, Cin = x_ref.shape
    Cout = y_ref.shape[-1]

    # Per-channel affine (previous BN folded to scale/shift) + optional ReLU,
    # computed in f32 on the VPU.
    h = x_ref[...] * scale_ref[...] + shift_ref[...]
    if apply_relu:
        h = jnp.maximum(h, 0.0)

    # In-kernel zero padding: zero only the four 1-wide border strips.
    pad_ref[0:1, :, :] = jnp.zeros((1, W + 2, Cin), jnp.float32)
    pad_ref[H + 1:H + 2, :, :] = jnp.zeros((1, W + 2, Cin), jnp.float32)
    pad_ref[1:H + 1, 0:1, :] = jnp.zeros((H, 1, Cin), jnp.float32)
    pad_ref[1:H + 1, W + 1:W + 2, :] = jnp.zeros((H, 1, Cin), jnp.float32)
    pad_ref[1:H + 1, 1:W + 1, :] = h

    # im2col: pack the 9 shifted taps into K = 9*Cin (bf16 for the MXU) ...
    for ky in range(3):
        for kx in range(3):
            t = ky * 3 + kx
            cols_ref[:, t * Cin:(t + 1) * Cin] = (
                pad_ref[ky:ky + H, kx:kx + W, :]
                .reshape(H * W, Cin).astype(cols_ref.dtype))

    # ... and issue ONE MXU matmul (bf16 inputs, f32 accumulation).
    acc = jnp.dot(cols_ref[...], w_ref[...],
                  preferred_element_type=jnp.float32)

    # One-pass batch-norm statistics for this image (reduced on host later).
    stats_ref[0:1, :] = jnp.sum(acc, axis=0, keepdims=True)
    stats_ref[1:2, :] = jnp.sum(acc * acc, axis=0, keepdims=True)

    y_ref[...] = acc.reshape(H, W, Cout)


def _bn_add_relu_kernel(y_ref, x_ref, scale_ref, shift_ref, o_ref):
    """out = relu(y*scale + shift + identity)   (BN2 folded into scale/shift)."""
    z = y_ref[...] * scale_ref[...] + shift_ref[...]
    o_ref[...] = jnp.maximum(z + x_ref[...], 0.0)


def _bn_scale_shift(stats, gamma, beta, count):
    """Fold training-mode (biased-variance) batch norm into scale/shift."""
    total = jnp.sum(stats, axis=0)                # (2, C): [sum; sum_sq]
    mean = total[0] / count
    var = total[1] / count - mean * mean
    scale = gamma * jax.lax.rsqrt(var + EPS)
    shift = beta - mean * scale
    return (scale.reshape(1, -1).astype(jnp.float32),
            shift.reshape(1, -1).astype(jnp.float32))


def _conv3x3_bn_stats(x, scale, shift, w_folded, *, apply_relu):
    N, H, W, Cin = x.shape
    Cout = w_folded.shape[-1]
    act_in = pl.BlockSpec((None, H, W, Cin), lambda n: (n, 0, 0, 0))
    act_out = pl.BlockSpec((None, H, W, Cout), lambda n: (n, 0, 0, 0))
    vec = pl.BlockSpec((1, Cin), lambda n: (0, 0))
    w_spec = pl.BlockSpec((9 * Cin, Cout), lambda n: (0, 0))
    stats_spec = pl.BlockSpec((None, 2, Cout), lambda n: (n, 0, 0))

    kernel = functools.partial(_affine_conv3x3_stats_kernel,
                               apply_relu=apply_relu)
    return pl.pallas_call(
        kernel,
        grid=(N,),
        in_specs=[act_in, vec, vec, w_spec],
        out_specs=(act_out, stats_spec),
        out_shape=(jax.ShapeDtypeStruct((N, H, W, Cout), jnp.float32),
                   jax.ShapeDtypeStruct((N, 2, Cout), jnp.float32)),
        scratch_shapes=[pltpu.VMEM((H + 2, W + 2, Cin), jnp.float32),
                        pltpu.VMEM((H * W, 9 * Cin), jnp.bfloat16)],
        compiler_params=pltpu.CompilerParams(
            dimension_semantics=("parallel",)),
    )(x, scale, shift, w_folded)


def basic_block(x_nchw, w1, g1, b1, w2, g2, b2):
    """BasicBlock.forward (stride=1, downsample=None). NCHW in / NCHW out."""
    x = jnp.transpose(x_nchw, (0, 2, 3, 1)).astype(jnp.float32)   # -> NHWC
    N, H, W, C = x.shape
    Cout = w1.shape[-1]
    if w1.shape != (3, 3, C, Cout) or w2.shape != (3, 3, Cout, Cout) or C != Cout:
        raise ValueError("only the stride=1, downsample=None BasicBlock "
                         "(inplanes == planes) configuration is supported")

    w1f = w1.reshape(9 * C, Cout).astype(jnp.bfloat16)   # taps folded into K
    w2f = w2.reshape(9 * Cout, Cout).astype(jnp.bfloat16)
    ones = jnp.ones((1, C), jnp.float32)
    zeros = jnp.zeros((1, C), jnp.float32)
    count = N * H * W

    # --- pass 1: conv1 + per-image BN1 statistics ---
    y1, s1 = _conv3x3_bn_stats(x, ones, zeros, w1f, apply_relu=False)
    scale1, shift1 = _bn_scale_shift(s1, g1, b1, count)

    # --- pass 2: bn1 + relu fused into conv2 + per-image BN2 statistics ---
    y2, s2 = _conv3x3_bn_stats(y1, scale1, shift1, w2f, apply_relu=True)
    scale2, shift2 = _bn_scale_shift(s2, g2, b2, count)

    # --- pass 3: bn2 + residual add + relu ---
    act = pl.BlockSpec((None, H, W, C), lambda n: (n, 0, 0, 0))
    vec = pl.BlockSpec((1, C), lambda n: (0, 0))
    out = pl.pallas_call(
        _bn_add_relu_kernel,
        grid=(N,),
        in_specs=[act, act, vec, vec],
        out_specs=act,
        out_shape=jax.ShapeDtypeStruct((N, H, W, C), jnp.float32),
        compiler_params=pltpu.CompilerParams(
            dimension_semantics=("parallel",)),
    )(y2, x, scale2, shift2)

    return jnp.transpose(out, (0, 3, 1, 2))               # -> NCHW


def _reference(x_nchw, w1, g1, b1, w2, g2, b2):
    """Pure-JAX reference of BasicBlock.forward (training-mode BN).

    Mirrors the kernel's intentional mixed precision: conv inputs in bf16,
    f32 accumulation, all BN / residual math in f32.
    """
    x = jnp.transpose(x_nchw, (0, 2, 3, 1)).astype(jnp.float32)
    dn = ("NHWC", "HWIO", "NHWC")

    def conv(v, w):
        return jax.lax.conv_general_dilated(
            v.astype(jnp.bfloat16), w.astype(jnp.bfloat16), (1, 1), "SAME",
            dimension_numbers=dn, preferred_element_type=jnp.float32)

    def bn(v, g, b):
        mu = jnp.mean(v, axis=(0, 1, 2), keepdims=True)
        var = jnp.mean((v - mu) ** 2, axis=(0, 1, 2), keepdims=True)
        return (v - mu) * jax.lax.rsqrt(var + EPS) * g + b

    out = jax.nn.relu(bn(conv(x, w1), g1, b1))
    out = bn(conv(out, w2), g2, b2)
    return jnp.transpose(jax.nn.relu(out + x), (0, 3, 1, 2))


if __name__ == "__main__":
    # BasicBlock(inplanes=4, planes=4, stride=1, downsample=None)
    N, C, H, W = 2, 4, 16, 16
    key = jax.random.PRNGKey(0)
    kx_, kw1, kw2, kg1, kb1, kg2, kb2 = jax.random.split(key, 7)

    x = jax.random.normal(kx_, (N, C, H, W), jnp.float32)
    w1 = jax.random.normal(kw1, (3, 3, C, C), jnp.float32) * 0.1   # HWIO
    w2 = jax.random.normal(kw2, (3, 3, C, C), jnp.float32) * 0.1   # HWIO
    g1 = 1.0 + 0.1 * jax.random.normal(kg1, (C,), jnp.float32)
    b1 = 0.1 * jax.random.normal(kb1, (C,), jnp.float32)
    g2 = 1.0 + 0.1 * jax.random.normal(kg2, (C,), jnp.float32)
    b2 = 0.1 * jax.random.normal(kb2, (C,), jnp.float32)

    out = jax.block_until_ready(basic_block(x, w1, g1, b1, w2, g2, b2))
    ref = jax.block_until_ready(_reference(x, w1, g1, b1, w2, g2, b2))

    assert out.shape == (N, C, H, W)
    max_err = float(jnp.max(jnp.abs(out - ref)))
    assert jnp.allclose(out, ref, rtol=5e-3, atol=5e-3), max_err
    print("KERNEL_OK")
</pallas_src>

<mosaic_0001>
module attributes {stable_mosaic.version = 11 : i64} {
  func.func @_affine_conv3x3_stats_kernel(%arg0: i32, %arg1: memref<1x16x16x4xf32, #tpu.memory_space<vmem>>, %arg2: memref<1x4xf32, #tpu.memory_space<vmem>>, %arg3: memref<1x4xf32, #tpu.memory_space<vmem>>, %arg4: memref<36x4xbf16, #tpu.memory_space<vmem>>, %arg5: memref<1x16x16x4xf32, #tpu.memory_space<vmem>>, %arg6: memref<1x2x4xf32, #tpu.memory_space<vmem>>, %arg7: memref<18x18x4xf32, #tpu.memory_space<vmem>>, %arg8: memref<256x36xbf16, #tpu.memory_space<vmem>>) attributes {dimension_semantics = [#tpu.dimension_semantics<parallel>], iteration_bounds = array<i64: 2>, scalar_prefetch = 0 : i64, scratch_operands = 2 : i64, tpu.core_type = #tpu.core_type<tc>, window_params = [{transform_indices = @transform_0, window_bounds = array<i64: 1, 16, 16, 4>}, {pipeline_mode = #tpu.pipeline_mode<synchronous>, transform_indices = @transform_1, window_bounds = array<i64: 1, 4>}, {pipeline_mode = #tpu.pipeline_mode<synchronous>, transform_indices = @transform_2, window_bounds = array<i64: 1, 4>}, {pipeline_mode = #tpu.pipeline_mode<synchronous>, transform_indices = @transform_3, window_bounds = array<i64: 36, 4>}, {transform_indices = @transform_4, window_bounds = array<i64: 1, 16, 16, 4>}, {transform_indices = @transform_5, window_bounds = array<i64: 1, 2, 4>}]} {
    %c0 = arith.constant 0 : index
    %c0_0 = arith.constant 0 : index
    %c0_1 = arith.constant 0 : index
    %c0_2 = arith.constant 0 : index
    %0 = vector.load %arg1[%c0, %c0_0, %c0_1, %c0_2] : memref<1x16x16x4xf32, #tpu.memory_space<vmem>>, vector<1x16x16x4xf32>
    %1 = vector.shape_cast %0 : vector<1x16x16x4xf32> to vector<16x16x4xf32>
    %c0_3 = arith.constant 0 : index
    %c0_4 = arith.constant 0 : index
    %2 = vector.load %arg2[%c0_3, %c0_4] : memref<1x4xf32, #tpu.memory_space<vmem>>, vector<1x4xf32>
    %3 = vector.shape_cast %2 : vector<1x4xf32> to vector<1x1x4xf32>
    %4 = vector.broadcast %3 : vector<1x1x4xf32> to vector<16x16x4xf32>
    %5 = arith.mulf %1, %4 : vector<16x16x4xf32>
    %c0_5 = arith.constant 0 : index
    %c0_6 = arith.constant 0 : index
    %6 = vector.load %arg3[%c0_5, %c0_6] : memref<1x4xf32, #tpu.memory_space<vmem>>, vector<1x4xf32>
    %7 = vector.shape_cast %6 : vector<1x4xf32> to vector<1x1x4xf32>
    %8 = vector.broadcast %7 : vector<1x1x4xf32> to vector<16x16x4xf32>
    %9 = arith.addf %5, %8 : vector<16x16x4xf32>
    %cst = arith.constant 0.000000e+00 : f32
    %10 = vector.broadcast %cst : f32 to vector<1x18x4xf32>
    %c0_7 = arith.constant 0 : index
    %c0_8 = arith.constant 0 : index
    %c0_9 = arith.constant 0 : index
    %11 = vector.load %arg7[%c0_7, %c0_8, %c0_9] : memref<18x18x4xf32, #tpu.memory_space<vmem>>, vector<1x18x4xf32>
    tpu.vector_store %arg7[%c0_7, %c0_8, %c0_9], %10 {strides = array<i32>} : memref<18x18x4xf32, #tpu.memory_space<vmem>>, vector<1x18x4xf32>,
    %cst_10 = arith.constant 0.000000e+00 : f32
    %12 = vector.broadcast %cst_10 : f32 to vector<1x18x4xf32>
    %c17 = arith.constant 17 : index
    %c0_11 = arith.constant 0 : index
    %c0_12 = arith.constant 0 : index
    %13 = vector.load %arg7[%c17, %c0_11, %c0_12] : memref<18x18x4xf32, #tpu.memory_space<vmem>>, vector<1x18x4xf32>
    tpu.vector_store %arg7[%c17, %c0_11, %c0_12], %12 {strides = array<i32>} : memref<18x18x4xf32, #tpu.memory_space<vmem>>, vector<1x18x4xf32>,
    %cst_13 = arith.constant 0.000000e+00 : f32
    %14 = vector.broadcast %cst_13 : f32 to vector<16x1x4xf32>
    %c1 = arith.constant 1 : index
    %c0_14 = arith.constant 0 : index
    %c0_15 = arith.constant 0 : index
    %15 = vector.load %arg7[%c1, %c0_14, %c0_15] : memref<18x18x4xf32, #tpu.memory_space<vmem>>, vector<16x1x4xf32>
    tpu.vector_store %arg7[%c1, %c0_14, %c0_15], %14 {strides = array<i32>} : memref<18x18x4xf32, #tpu.memory_space<vmem>>, vector<16x1x4xf32>,
    %cst_16 = arith.constant 0.000000e+00 : f32
    %16 = vector.broadcast %cst_16 : f32 to vector<16x1x4xf32>
    %c1_17 = arith.constant 1 : index
    %c17_18 = arith.constant 17 : index
    %c0_19 = arith.constant 0 : index
    %17 = vector.load %arg7[%c1_17, %c17_18, %c0_19] : memref<18x18x4xf32, #tpu.memory_space<vmem>>, vector<16x1x4xf32>
    tpu.vector_store %arg7[%c1_17, %c17_18, %c0_19], %16 {strides = array<i32>} : memref<18x18x4xf32, #tpu.memory_space<vmem>>, vector<16x1x4xf32>,
    %c1_20 = arith.constant 1 : index
    %c1_21 = arith.constant 1 : index
    %c0_22 = arith.constant 0 : index
    %18 = vector.load %arg7[%c1_20, %c1_21, %c0_22] : memref<18x18x4xf32, #tpu.memory_space<vmem>>, vector<16x16x4xf32>
    tpu.vector_store %arg7[%c1_20, %c1_21, %c0_22], %9 {strides = array<i32>} : memref<18x18x4xf32, #tpu.memory_space<vmem>>, vector<16x16x4xf32>,
    %c0_23 = arith.constant 0 : index
    %c0_24 = arith.constant 0 : index
    %c0_25 = arith.constant 0 : index
    %19 = vector.load %arg7[%c0_23, %c0_24, %c0_25] : memref<18x18x4xf32, #tpu.memory_space<vmem>>, vector<16x16x4xf32>
    %20 = vector.shape_cast %19 : vector<16x16x4xf32> to vector<256x4xf32>
    %21 = arith.truncf %20 : vector<256x4xf32> to vector<256x4xbf16>
    %c0_26 = arith.constant 0 : index
    %c0_27 = arith.constant 0 : index
    %22 = vector.load %arg8[%c0_26, %c0_27] : memref<256x36xbf16, #tpu.memory_space<vmem>>, vector<256x4xbf16>
    tpu.vector_store %arg8[%c0_26, %c0_27], %21 {strides = array<i32>} : memref<256x36xbf16, #tpu.memory_space<vmem>>, vector<256x4xbf16>,
    %c0_28 = arith.constant 0 : index
    %c1_29 = arith.constant 1 : index
    %c0_30 = arith.constant 0 : index
    %23 = vector.load %arg7[%c0_28, %c1_29, %c0_30] : memref<18x18x4xf32, #tpu.memory_space<vmem>>, vector<16x16x4xf32>
    %24 = vector.shape_cast %23 : vector<16x16x4xf32> to vector<256x4xf32>
    %25 = arith.truncf %24 : vector<256x4xf32> to vector<256x4xbf16>
    %c0_31 = arith.constant 0 : index
    %c4 = arith.constant 4 : index
    %26 = vector.load %arg8[%c0_31, %c4] : memref<256x36xbf16, #tpu.memory_space<vmem>>, vector<256x4xbf16>
    tpu.vector_store %arg8[%c0_31, %c4], %25 {strides = array<i32>} : memref<256x36xbf16, #tpu.memory_space<vmem>>, vector<256x4xbf16>,
    %c0_32 = arith.constant 0 : index
    %c2 = arith.constant 2 : index
    %c0_33 = arith.constant 0 : index
    %27 = vector.load %arg7[%c0_32, %c2, %c0_33] : memref<18x18x4xf32, #tpu.memory_space<vmem>>, vector<16x16x4xf32>
    %28 = vector.shape_cast %27 : vector<16x16x4xf32> to vector<256x4xf32>
    %29 = arith.truncf %28 : vector<256x4xf32> to vector<256x4xbf16>
    %c0_34 = arith.constant 0 : index
    %c8 = arith.constant 8 : index
    %30 = vector.load %arg8[%c0_34, %c8] : memref<256x36xbf16, #tpu.memory_space<vmem>>, vector<256x4xbf16>
    tpu.vector_store %arg8[%c0_34, %c8], %29 {strides = array<i32>} : memref<256x36xbf16, #tpu.memory_space<vmem>>, vector<256x4xbf16>,
    %c1_35 = arith.constant 1 : index
    %c0_36 = arith.constant 0 : index
    %c0_37 = arith.constant 0 : index
    %31 = vector.load %arg7[%c1_35, %c0_36, %c0_37] : memref<18x18x4xf32, #tpu.memory_space<vmem>>, vector<16x16x4xf32>
    %32 = vector.shape_cast %31 : vector<16x16x4xf32> to vector<256x4xf32>
    %33 = arith.truncf %32 : vector<256x4xf32> to vector<256x4xbf16>
    %c0_38 = arith.constant 0 : index
    %c12 = arith.constant 12 : index
    %34 = vector.load %arg8[%c0_38, %c12] : memref<256x36xbf16, #tpu.memory_space<vmem>>, vector<256x4xbf16>
    tpu.vector_store %arg8[%c0_38, %c12], %33 {strides = array<i32>} : memref<256x36xbf16, #tpu.memory_space<vmem>>, vector<256x4xbf16>,
    %c1_39 = arith.constant 1 : index
    %c1_40 = arith.constant 1 : index
    %c0_41 = arith.constant 0 : index
    %35 = vector.load %arg7[%c1_39, %c1_40, %c0_41] : memref<18x18x4xf32, #tpu.memory_space<vmem>>, vector<16x16x4xf32>
    %36 = vector.shape_cast %35 : vector<16x16x4xf32> to vector<256x4xf32>
    %37 = arith.truncf %36 : vector<256x4xf32> to vector<256x4xbf16>
    %c0_42 = arith.constant 0 : index
    %c16 = arith.constant 16 : index
    %38 = vector.load %arg8[%c0_42, %c16] : memref<256x36xbf16, #tpu.memory_space<vmem>>, vector<256x4xbf16>
    tpu.vector_store %arg8[%c0_42, %c16], %37 {strides = array<i32>} : memref<256x36xbf16, #tpu.memory_space<vmem>>, vector<256x4xbf16>,
    %c1_43 = arith.constant 1 : index
    %c2_44 = arith.constant 2 : index
    %c0_45 = arith.constant 0 : index
    %39 = vector.load %arg7[%c1_43, %c2_44, %c0_45] : memref<18x18x4xf32, #tpu.memory_space<vmem>>, vector<16x16x4xf32>
    %40 = vector.shape_cast %39 : vector<16x16x4xf32> to vector<256x4xf32>
    %41 = arith.truncf %40 : vector<256x4xf32> to vector<256x4xbf16>
    %c0_46 = arith.constant 0 : index
    %c20 = arith.constant 20 : index
    %42 = vector.load %arg8[%c0_46, %c20] : memref<256x36xbf16, #tpu.memory_space<vmem>>, vector<256x4xbf16>
    tpu.vector_store %arg8[%c0_46, %c20], %41 {strides = array<i32>} : memref<256x36xbf16, #tpu.memory_space<vmem>>, vector<256x4xbf16>,
    %c2_47 = arith.constant 2 : index
    %c0_48 = arith.constant 0 : index
    %c0_49 = arith.constant 0 : index
    %43 = vector.load %arg7[%c2_47, %c0_48, %c0_49] : memref<18x18x4xf32, #tpu.memory_space<vmem>>, vector<16x16x4xf32>
    %44 = vector.shape_cast %43 : vector<16x16x4xf32> to vector<256x4xf32>
    %45 = arith.truncf %44 : vector<256x4xf32> to vector<256x4xbf16>
    %c0_50 = arith.constant 0 : index
    %c24 = arith.constant 24 : index
    %46 = vector.load %arg8[%c0_50, %c24] : memref<256x36xbf16, #tpu.memory_space<vmem>>, vector<256x4xbf16>
    tpu.vector_store %arg8[%c0_50, %c24], %45 {strides = array<i32>} : memref<256x36xbf16, #tpu.memory_space<vmem>>, vector<256x4xbf16>,
    %c2_51 = arith.constant 2 : index
    %c1_52 = arith.constant 1 : index
    %c0_53 = arith.constant 0 : index
    %47 = vector.load %arg7[%c2_51, %c1_52, %c0_53] : memref<18x18x4xf32, #tpu.memory_space<vmem>>, vector<16x16x4xf32>
    %48 = vector.shape_cast %47 : vector<16x16x4xf32> to vector<256x4xf32>
    %49 = arith.truncf %48 : vector<256x4xf32> to vector<256x4xbf16>
    %c0_54 = arith.constant 0 : index
    %c28 = arith.constant 28 : index
    %50 = vector.load %arg8[%c0_54, %c28] : memref<256x36xbf16, #tpu.memory_space<vmem>>, vector<256x4xbf16>
    tpu.vector_store %arg8[%c0_54, %c28], %49 {strides = array<i32>} : memref<256x36xbf16, #tpu.memory_space<vmem>>, vector<256x4xbf16>,
    %c2_55 = arith.constant 2 : index
    %c2_56 = arith.constant 2 : index
    %c0_57 = arith.constant 0 : index
    %51 = vector.load %arg7[%c2_55, %c2_56, %c0_57] : memref<18x18x4xf32, #tpu.memory_space<vmem>>, vector<16x16x4xf32>
    %52 = vector.shape_cast %51 : vector<16x16x4xf32> to vector<256x4xf32>
    %53 = arith.truncf %52 : vector<256x4xf32> to vector<256x4xbf16>
    %c0_58 = arith.constant 0 : index
    %c32 = arith.constant 32 : index
    %54 = vector.load %arg8[%c0_58, %c32] : memref<256x36xbf16, #tpu.memory_space<vmem>>, vector<256x4xbf16>
    tpu.vector_store %arg8[%c0_58, %c32], %53 {strides = array<i32>} : memref<256x36xbf16, #tpu.memory_space<vmem>>, vector<256x4xbf16>,
    %c0_59 = arith.constant 0 : index
    %c0_60 = arith.constant 0 : index
    %55 = vector.load %arg8[%c0_59, %c0_60] : memref<256x36xbf16, #tpu.memory_space<vmem>>, vector<256x36xbf16>
    %c0_61 = arith.constant 0 : index
    %c0_62 = arith.constant 0 : index
    %56 = vector.load %arg4[%c0_61, %c0_62] : memref<36x4xbf16, #tpu.memory_space<vmem>>, vector<36x4xbf16>
    %cst_63 = arith.constant dense<0.000000e+00> : vector<256x4xf32>
    %57 = tpu.matmul %55, %56, %cst_63 {dimension_numbers = #tpu.dot_dimension_numbers<[1], [0], [0], [1], [0, 0, 1, 1], [], []>} : vector<256x36xbf16>, vector<36x4xbf16>, vector<256x4xf32> -> vector<256x4xf32>
    %cst_64 = arith.constant dense<0.000000e+00> : vector<4xf32>
    %58 = vector.multi_reduction <add>, %57, %cst_64 [0] : vector<256x4xf32> to vector<4xf32>
    %59 = vector.shape_cast %58 : vector<4xf32> to vector<1x4xf32>
    %c0_65 = arith.constant 0 : index
    %c0_66 = arith.constant 0 : index
    %c0_67 = arith.constant 0 : index
    %60 = vector.load %arg6[%c0_65, %c0_66, %c0_67] : memref<1x2x4xf32, #tpu.memory_space<vmem>>, vector<1x1x4xf32>
    %61 = vector.shape_cast %60 : vector<1x1x4xf32> to vector<1x4xf32>
    %62 = vector.shape_cast %59 : vector<1x4xf32> to vector<1x1x4xf32>
    tpu.vector_store %arg6[%c0_65, %c0_66, %c0_67], %62 {strides = array<i32>} : memref<1x2x4xf32, #tpu.memory_space<vmem>>, vector<1x1x4xf32>,
    %63 = arith.mulf %57, %57 : vector<256x4xf32>
    %cst_68 = arith.constant dense<0.000000e+00> : vector<4xf32>
    %64 = vector.multi_reduction <add>, %63, %cst_68 [0] : vector<256x4xf32> to vector<4xf32>
    %65 = vector.shape_cast %64 : vector<4xf32> to vector<1x4xf32>
    %c0_69 = arith.constant 0 : index
    %c1_70 = arith.constant 1 : index
    %c0_71 = arith.constant 0 : index
    %66 = vector.load %arg6[%c0_69, %c1_70, %c0_71] : memref<1x2x4xf32, #tpu.memory_space<vmem>>, vector<1x1x4xf32>
    %67 = vector.shape_cast %66 : vector<1x1x4xf32> to vector<1x4xf32>
    %68 = vector.shape_cast %65 : vector<1x4xf32> to vector<1x1x4xf32>
    tpu.vector_store %arg6[%c0_69, %c1_70, %c0_71], %68 {strides = array<i32>} : memref<1x2x4xf32, #tpu.memory_space<vmem>>, vector<1x1x4xf32>,
    %69 = vector.shape_cast %57 : vector<256x4xf32> to vector<16x16x4xf32>
    %c0_72 = arith.constant 0 : index
    %c0_73 = arith.constant 0 : index
    %c0_74 = arith.constant 0 : index
    %c0_75 = arith.constant 0 : index
    %70 = vector.load %arg5[%c0_72, %c0_73, %c0_74, %c0_75] : memref<1x16x16x4xf32, #tpu.memory_space<vmem>>, vector<1x16x16x4xf32>
    %71 = vector.shape_cast %70 : vector<1x16x16x4xf32> to vector<16x16x4xf32>
    %72 = vector.shape_cast %69 : vector<16x16x4xf32> to vector<1x16x16x4xf32>
    tpu.vector_store %arg5[%c0_72, %c0_73, %c0_74, %c0_75], %72 {strides = array<i32>} : memref<1x16x16x4xf32, #tpu.memory_space<vmem>>, vector<1x16x16x4xf32>,
    return
  }
  func.func @transform_0(%arg0: i32) -> (i32, i32, i32, i32) {
    %c0_i32 = arith.constant 0 : i32
    %c0_i32_0 = arith.constant 0 : i32
    %c0_i32_1 = arith.constant 0 : i32
    %c0_i32_2 = arith.constant 0 : i32
    return %arg0, %c0_i32, %c0_i32_0, %c0_i32_1 : i32, i32, i32, i32
  }
  func.func @transform_1(%arg0: i32) -> (i32, i32) {
    %c0_i32 = arith.constant 0 : i32
    %c0_i32_0 = arith.constant 0 : i32
    %c0_i32_1 = arith.constant 0 : i32
    return %c0_i32, %c0_i32_0 : i32, i32
  }
  func.func @transform_2(%arg0: i32) -> (i32, i32) {
    %c0_i32 = arith.constant 0 : i32
    %c0_i32_0 = arith.constant 0 : i32
    %c0_i32_1 = arith.constant 0 : i32
    return %c0_i32, %c0_i32_0 : i32, i32
  }
  func.func @transform_3(%arg0: i32) -> (i32, i32) {
    %c0_i32 = arith.constant 0 : i32
    %c0_i32_0 = arith.constant 0 : i32
    %c0_i32_1 = arith.constant 0 : i32
    return %c0_i32, %c0_i32_0 : i32, i32
  }
  func.func @transform_4(%arg0: i32) -> (i32, i32, i32, i32) {
    %c0_i32 = arith.constant 0 : i32
    %c0_i32_0 = arith.constant 0 : i32
    %c0_i32_1 = arith.constant 0 : i32
    %c0_i32_2 = arith.constant 0 : i32
    return %arg0, %c0_i32, %c0_i32_0, %c0_i32_1 : i32, i32, i32, i32
  }
  func.func @transform_5(%arg0: i32) -> (i32, i32, i32) {
    %c0_i32 = arith.constant 0 : i32
    %c0_i32_0 = arith.constant 0 : i32
    %c0_i32_1 = arith.constant 0 : i32
    return %arg0, %c0_i32, %c0_i32_0 : i32, i32, i32
  }
}

</mosaic_0001>

<bundles_post_ra>
// kernel: tpu_custom_call.1
= control target key start
LH: loop header
LB: loop body
LE: loop exit
PB: predicated region body
PF: predicated region fallthrough
CT: control target
= control target key end

     0   :  { %11 = vsyncpa [#allocation5], 0  ;;  %s3130_s0 = inlined_call_operand.vmem [shape: f32[2,16,16,4], index: 0, kind: input, shape index: {}]   ;;  %s3131_s1 = inlined_call_operand.vmem [shape: f32[1,4], index: 1, kind: input, shape index: {}]   ;;  %s3132_s2 = inlined_call_operand.vmem [shape: f32[1,4], index: 2, kind: input, shape index: {}]   ;;  %s3133_s3 = inlined_call_operand.vmem [shape: bf16[36,4], index: 3, kind: input, shape index: {}]   ;;  %s3134_s4 = inlined_call_operand.vmem [shape: f32[2,16,16,4], index: 4, kind: output, shape index: {0}]   ;;  %s3135_s5 = inlined_call_operand.hbm [shape: f32[2,2,4], index: 5, kind: output, shape index: {1}]  }
   0x1   :  { %13 = vsyncpa [#allocation5 + $0x1], 0  ;;  %s2335_s18 = smov 0   ;;  %s2337_s19 = smov 0  }
   0x2   :  { %s2339_s20 = smov 0   ;;  %s2341_s21 = smov 0  }
   0x3 LB: > { %s2356_s22 = sadd.s32 4294967295, %s2293_s21   ;;  %s2079_s23 = sadd.s32 4294967294, %s2293_s21   ;;  %s2293_s21 = sphi %s2341_s21, %s3141_s21   ;;  %s2289_s20 = sphi %s2339_s20, %s3140_s20   ;;  %s2285_s19 = sphi %s2337_s19, %s3139_s19   ;;  %s2281_s18 = sphi %s2335_s18, %s3138_s18  }
   0x4   : > { %s2360_s24 = sadd.s32 1, %s2293_s21   ;;  %s141_s25 = sadd.s32 1, %s2289_s20 }
   0x5   : > { %s138_s26 = ssub.s32 %s2293_s21, %s2360_s24  ;;  %p151_p0 = scmp.ne.s32.totalorder %s2289_s20, %s2285_s19 }
   0x6   : > { %p139_p1 = scmp.eq.s32.totalorder %s138_s26, 0  ;;  %p152_p2 = scmp.eq.s32.totalorder %s2356_s22, 1 }
   0x7   : > { %p157_p3 = scmp.ne.s32.totalorder %s2285_s19, %s2281_s18  ;;  %p158_p4 = scmp.eq.s32.totalorder %s2079_s23, 1 }
   0x8   : > { %s2371_s27 = scalar_select %p139_p1, %s2289_s20, %s141_s25  }
   0x9   : > { %p2373_p5 = por %p152_p2, %p151_p0  ;;  %p2377_p6 = por %p158_p4, %p157_p3 }
   0xa   : > { %p2082_p7 = scmp.ge.s32.totalorder %s2293_s21, 1  ;;  %p193_p8 = scmp.lt.s32.totalorder %s2293_s21, 3 }
   0xc   : > { %p194_p9 = pnand %p2082_p7, %p193_p8 }
   0xd   : > { %vm347_vm0 = vcmask (!%p194_p9), 31744   ;;  %vm350_vm1 = vcmask (!%p194_p9), 25600   ;;  %vm357_vm2 = vcmask (!%p194_p9), 24576   ;;  %v2295_v0 = vmov (!%p194_p9), 0.0   ;;  %p226_p10 = scmp.lt.s32.totalorder (!%p194_p9), %s2356_s22, 1  ;;  %s2296_s14 = smov (!%p194_p9), 4  }
   0xe   : > { %197 = sbr.rel (%p194_p9) target bundleno = 666 (0x29a), region = 36  ;;  %348 = vst.msk [vmem:[#allocation2] sm:$0xff] (!%p194_p9), %vm347_vm0, %v2295_v0  ;;  %349 = vst.msk [vmem:[#allocation2 + $0x8] sm:$0xff] (!%p194_p9), %vm347_vm0, %v2295_v0  ;;  %v2429_v1 = vld [vmem:[%s3131_s1] ss:$0 sm:$0xff] (!%p194_p9)  ;;  %s2297_s15 = smov (!%p194_p9), 8  }
   0xf   : > { %351 = vst.msk [vmem:[#allocation2 + $0x10] sm:$0x3] (!%p194_p9), %vm350_vm1, %v2295_v0  ;;  %355 = vst.msk [vmem:[#allocation2 + $0x1a8] sm:$0x3] (!%p194_p9), %vm350_vm1, %v2295_v0  ;;  %v2441_v2 = vld [vmem:[%s3132_s2] ss:$0 sm:$0xff] (!%p194_p9) }
  0x10   : > { %353 = vst.msk [vmem:[#allocation2 + $0x198] sm:$0xff] (!%p194_p9), %vm347_vm0, %v2295_v0  ;;  %354 = vst.msk [vmem:[#allocation2 + $0x1a0] sm:$0xff] (!%p194_p9), %vm347_vm0, %v2295_v0  ;;  %s2298_s16 = smov (!%p194_p9), 12   ;;  %s2299_s17 = smov (!%p194_p9), 16   ;;  %vm1604_vm3 = vcmask (!%p194_p9), 1041408   ;;  %vm598_vm4 = vcmask (!%p194_p9), 64544  }
  0x11   : > { %374 = vst.msk [vmem:[#allocation2 + $0x29] sm:$0x1] (!%p194_p9), %vm357_vm2, %v2295_v0  ;;  %358 = vst.msk [vmem:[#allocation2 + $0x18] sm:$0x1] (!%p194_p9), %vm357_vm2, %v2295_v0  ;;  %s2300_s23 = smov (!%p194_p9), 20   ;;  %s2301_s25 = smov (!%p194_p9), 24  }
  0x12   : > { %359 = vst.msk [vmem:[#allocation2 + $0x30] sm:$0x1] (!%p194_p9), %vm357_vm2, %v2295_v0  ;;  %360 = vst.msk [vmem:[#allocation2 + $0x48] sm:$0x1] (!%p194_p9), %vm357_vm2, %v2295_v0  ;;  %s2302_s10 = smov (!%p194_p9), 28   ;;  %s2303_s26 = smov (!%p194_p9), 32  }
  0x13   : > { %361 = vst.msk [vmem:[#allocation2 + $0x60] sm:$0x1] (!%p194_p9), %vm357_vm2, %v2295_v0  ;;  %362 = vst.msk [vmem:[#allocation2 + $0x78] sm:$0x1] (!%p194_p9), %vm357_vm2, %v2295_v0  ;;  %vm727_vm5 = vcmask (!%p194_p9), 97344   ;;  %vm856_vm6 = vcmask (!%p194_p9), 130144  }
  0x14   : > { %363 = vst.msk [vmem:[#allocation2 + $0x90] sm:$0x1] (!%p194_p9), %vm357_vm2, %v2295_v0  ;;  %364 = vst.msk [vmem:[#allocation2 + $0xa8] sm:$0x1] (!%p194_p9), %vm357_vm2, %v2295_v0  ;;  %vm985_vm7 = vcmask (!%p194_p9), 162944   ;;  %vm1114_vm8 = vcmask (!%p194_p9), 195744  }
  0x15   : > { %365 = vst.msk [vmem:[#allocation2 + $0xc0] sm:$0x1] %vm357_vm2, %v2295_v0  ;;  %366 = vst.msk [vmem:[#allocation2 + $0xd8] sm:$0x1] %vm357_vm2, %v2295_v0  ;;  %s2423_s30 = scalar_select %p226_p10, %s2356_s22, 1  ;;  %v486_v6 = vld [vmem:[#allocation2 + $0x1] sm:$0xff] }
  0x16   : > { %367 = vst.msk [vmem:[#allocation2 + $0xf0] sm:$0x1] %vm357_vm2, %v2295_v0  ;;  %368 = vst.msk [vmem:[#allocation2 + $0x108] sm:$0x1] %vm357_vm2, %v2295_v0  ;;  %v487_v7 = vld [vmem:[#allocation2 + $0x9] sm:$0xff]  ;;  %v422_v48 = vld [vmem:[#allocation2] sm:$0xff] }
  0x17   : > { %369 = vst.msk [vmem:[#allocation2 + $0x120] sm:$0x1] %vm357_vm2, %v2295_v0  ;;  %370 = vst.msk [vmem:[#allocation2 + $0x138] sm:$0x1] %vm357_vm2, %v2295_v0  ;;  %s2113_s6 = sshll.u32 %s2423_s30, 8  ;;  %v615_v8 = vld [vmem:[#allocation2 + $0x2] sm:$0xff]  ;;  %v518_v12 = vpack.c.bf16 %v487_v7, %v486_v6 }
  0x18   : > { %371 = vst.msk [vmem:[#allocation2 + $0x150] sm:$0x1] %vm357_vm2, %v2295_v0  ;;  %372 = vst.msk [vmem:[#allocation2 + $0x168] sm:$0x1] %vm357_vm2, %v2295_v0  ;;  %s2436_s11 = scalar_lea.vmem %s3130_s0, %s2113_s6  ;;  %v616_v13 = vld [vmem:[#allocation2 + $0xa] sm:$0xff]  ;;  %vm1244_vm9 = vcmask 228544  }
  0x19   : > { %373 = vst.msk [vmem:[#allocation2 + $0x180] sm:$0x1] %vm357_vm2, %v2295_v0  ;;  %375 = vst.msk [vmem:[#allocation2 + $0x41] sm:$0x1] %vm357_vm2, %v2295_v0  ;;  %v237_v3 = vld [vmem:[%s2436_s11] sm:$0xff]  ;;  %v238_v4 = vld [vmem:[%s2436_s11 + $0x8] sm:$0xff]  ;;  %v647_v16 = vpack.c.bf16 %v616_v13, %v615_v8  ;;  %550 = vrot.lane.b32.xlu0 %v518_v12, %s2296_s14 }
  0x1a   : > { %376 = vst.msk [vmem:[#allocation2 + $0x59] sm:$0x1] %vm357_vm2, %v2295_v0  ;;  %377 = vst.msk [vmem:[#allocation2 + $0x71] sm:$0x1] %vm357_vm2, %v2295_v0  ;;  %v239_v5 = vld [vmem:[%s2436_s11 + $0x10] sm:$0xff]  ;;  %v276_v9 = vmul.f32 %v2429_v1, %v237_v3  ;;  %v277_v10 = vmul.f32 %v2429_v1, %v238_v4  ;;  %v240_v14 = vld [vmem:[%s2436_s11 + $0x18] sm:$0xff] }
  0x1b   : > { %378 = vst.msk [vmem:[#allocation2 + $0x89] sm:$0x1] %vm357_vm2, %v2295_v0  ;;  %379 = vst.msk [vmem:[#allocation2 + $0xa1] sm:$0x1] %vm357_vm2, %v2295_v0  ;;  %v278_v11 = vmul.f32 %v2429_v1, %v239_v5  ;;  %v241_v15 = vld [vmem:[%s2436_s11 + $0x20] sm:$0xff]  ;;  %v279_v19 = vmul.f32 %v2429_v1, %v240_v14  ;;  %v242_v20 = vld [vmem:[%s2436_s11 + $0x28] sm:$0xff]  ;;  %679 = vrot.lane.b32.xlu1 %v647_v16, %s2297_s15 }
  0x1c   : > { %380 = vst.msk [vmem:[#allocation2 + $0xb9] sm:$0x1] %vm357_vm2, %v2295_v0  ;;  %381 = vst.msk [vmem:[#allocation2 + $0xd1] sm:$0x1] %vm357_vm2, %v2295_v0  ;;  %v315_v17 = vadd.f32 %v2441_v2, %v276_v9  ;;  %v316_v18 = vadd.f32 %v2441_v2, %v277_v10  ;;  %v243_v21 = vld [vmem:[%s2436_s11 + $0x30] sm:$0xff]  ;;  %v244_v22 = vld [vmem:[%s2436_s11 + $0x38] sm:$0xff]  ;;  %v280_v24 = vmul.f32 %v2429_v1, %v241_v15 }
  0x1d   : > { %382 = vst.msk [vmem:[#allocation2 + $0xe9] sm:$0x1] %vm357_vm2, %v2295_v0  ;;  %383 = vst.msk [vmem:[#allocation2 + $0x101] sm:$0x1] %vm357_vm2, %v2295_v0  ;;  %v317_v23 = vadd.f32 %v2441_v2, %v278_v11  ;;  %v281_v25 = vmul.f32 %v2429_v1, %v242_v20  ;;  %v282_v26 = vmul.f32 %v2429_v1, %v243_v21  ;;  %v245_v27 = vld [vmem:[%s2436_s11 + $0x40] sm:$0xff]  ;;  %v246_v28 = vld [vmem:[%s2436_s11 + $0x48] sm:$0xff] }
  0x1e   : > { %384 = vst.msk [vmem:[#allocation2 + $0x119] sm:$0x1] %vm357_vm2, %v2295_v0  ;;  %385 = vst.msk [vmem:[#allocation2 + $0x131] sm:$0x1] %vm357_vm2, %v2295_v0  ;;  %v247_v29 = vld [vmem:[%s2436_s11 + $0x50] sm:$0xff]  ;;  %v318_v30 = vadd.f32 %v2441_v2, %v279_v19  ;;  %v283_v31 = vmul.f32 %v2429_v1, %v244_v22  ;;  %v284_v32 = vmul.f32 %v2429_v1, %v245_v27  ;;  %v248_v34 = vld [vmem:[%s2436_s11 + $0x58] sm:$0xff] }
  0x1f   : > { %386 = vst.msk [vmem:[#allocation2 + $0x149] sm:$0x1] %vm357_vm2, %v2295_v0  ;;  %387 = vst.msk [vmem:[#allocation2 + $0x161] sm:$0x1] %vm357_vm2, %v2295_v0  ;;  %v285_v33 = vmul.f32 %v2429_v1, %v246_v28  ;;  %v249_v35 = vld [vmem:[%s2436_s11 + $0x60] sm:$0xff]  ;;  %v250_v36 = vld [vmem:[%s2436_s11 + $0x68] sm:$0xff]  ;;  %v319_v37 = vadd.f32 %v2441_v2, %v280_v24  ;;  %v320_v38 = vadd.f32 %v2441_v2, %v281_v25 }
  0x20   : > { %388 = vst.msk [vmem:[#allocation2 + $0x179] sm:$0x1] %vm357_vm2, %v2295_v0  ;;  %389 = vst.msk [vmem:[#allocation2 + $0x191] sm:$0x1] %vm357_vm2, %v2295_v0  ;;  %v321_v39 = vadd.f32 %v2441_v2, %v282_v26  ;;  %v286_v40 = vmul.f32 %v2429_v1, %v247_v29  ;;  %v251_v41 = vld [vmem:[%s2436_s11 + $0x70] sm:$0xff]  ;;  %v252_v42 = vld [vmem:[%s2436_s11 + $0x78] sm:$0xff]  ;;  %v322_v44 = vadd.f32 %v2441_v2, %v283_v31 }
  0x21   : > { %390 = vst.msk [vmem:[#allocation2 + $0x19] sm:$0xff] %vm347_vm0, %v315_v17  ;;  %391 = vst.msk [vmem:[#allocation2 + $0x21] sm:$0xff] %vm347_vm0, %v316_v18  ;;  %v423_v43 = vld [vmem:[#allocation2 + $0x8] sm:$0xff]  ;;  %v323_v45 = vadd.f32 %v2441_v2, %v284_v32  ;;  %v324_v46 = vadd.f32 %v2441_v2, %v285_v33  ;;  %v287_v47 = vmul.f32 %v2429_v1, %v248_v34  ;;  %v253_v49 = vld [vmem:[%s2436_s11 + $0x80] sm:$0xff]  ;;  %vm1373_vm10 = vcmask 261344   ;;  %s223_s30 = sand.u32 1, %s2285_s19  }
  0x22   : > { %392 = vst.msk [vmem:[#allocation2 + $0x31] sm:$0xff] %vm347_vm0, %v317_v23  ;;  %393 = vst.msk [vmem:[#allocation2 + $0x39] sm:$0xff] %vm347_vm0, %v318_v30  ;;  %v254_v50 = vld [vmem:[%s2436_s11 + $0x88] sm:$0xff]  ;;  %v325_v51 = vadd.f32 %v2441_v2, %v286_v40  ;;  %v288_v52 = vmul.f32 %v2429_v1, %v249_v35  ;;  %v289_v53 = vmul.f32 %v2429_v1, %v250_v36  ;;  %v255_v59 = vld [vmem:[%s2436_s11 + $0x90] sm:$0xff]  ;;  %vm1502_vm11 = vcmask 294144  }
  0x23   : > { %394 = vst.msk [vmem:[#allocation2 + $0x49] sm:$0xff] %vm347_vm0, %v319_v37  ;;  %395 = vst.msk [vmem:[#allocation2 + $0x51] sm:$0xff] %vm347_vm0, %v320_v38  ;;  %v290_v54 = vmul.f32 %v2429_v1, %v251_v41  ;;  %v326_v55 = vadd.f32 %v2441_v2, %v287_v47  ;;  %v291_v56 = vmul.f32 %v2429_v1, %v252_v42  ;;  %v256_v60 = vld [vmem:[%s2436_s11 + $0x98] sm:$0xff]  ;;  %vm1555_vm12 = vcmask 293888  }
  0x24   : > { %396 = vst.msk [vmem:[#allocation2 + $0x61] sm:$0xff] %vm347_vm0, %v321_v39  ;;  %397 = vst.msk [vmem:[#allocation2 + $0x69] sm:$0xff] %vm347_vm0, %v322_v44  ;;  %v454_v57 = vpack.c.bf16 %v423_v43, %v422_v48  ;;  %v292_v58 = vmul.f32 %v2429_v1, %v253_v49  ;;  %v327_v61 = vadd.f32 %v2441_v2, %v288_v52 }
  0x25   : > { %398 = vst.msk [vmem:[#allocation2 + $0x79] sm:$0xff] %vm347_vm0, %v323_v45  ;;  %399 = vst.msk [vmem:[#allocation2 + $0x81] sm:$0xff] %vm347_vm0, %v324_v46  ;;  %v328_v62 = vadd.f32 %v2441_v2, %v289_v53  ;;  %v329_v63 = vadd.f32 %v2441_v2, %v290_v54  ;;  %v293_v0 = vmul.f32 %v2429_v1, %v254_v50  ;;  %v2229_v53 = vld [vmem:[%s3133_s3 + $0x8] sm:$0xff]   ;;  %v257_v54 = vld [vmem:[%s2436_s11 + $0xa0] sm:$0xff] }
  0x26   : > { %400 = vst.msk [vmem:[#allocation2 + $0x91] sm:$0xff] %vm347_vm0, %v325_v51  ;;  %401 = vst.msk [vmem:[#allocation2 + $0x99] sm:$0xff] %vm347_vm0, %v326_v55  ;;  %v330_v3 = vadd.f32 %v2441_v2, %v291_v56  ;;  %v331_v4 = vadd.f32 %v2441_v2, %v292_v58  ;;  %v294_v9 = vmul.f32 %v2429_v1, %v255_v59  ;;  %v2228_v51 = vld [vmem:[%s3133_s3] sm:$0xff]   ;;  %v258_v55 = vld [vmem:[%s2436_s11 + $0xa8] sm:$0xff] }
  0x27   : > { %470 = vst.msk [vmem:[#allocation3] sm:$0xff] %vm347_vm0, %v454_v57  ;;  %402 = vst.msk [vmem:[#allocation2 + $0xa9] sm:$0xff] %vm347_vm0, %v327_v61  ;;  %v332_v8 = vadd.f32 %v2441_v2, %v293_v0  ;;  %v295_v10 = vmul.f32 %v2429_v1, %v256_v60  ;;  %2134 = vmatprep.subr.bf16.mxu0 %v2228_v51  ;;  %v296_v56 = vmul.f32 %v2429_v1, %v257_v54  ;;  %v2230_v59 = vld [vmem:[%s3133_s3 + $0x10] ss:$0 sps:$4 sm:$0x33]   ;;  %v260_v0 = vld [vmem:[%s2436_s11 + $0xb8] sm:$0xff] }
  0x28   : > { %v488_v5 = vld [vmem:[#allocation2 + $0x19] sm:$0xff]  ;;  %v489_v6 = vld [vmem:[#allocation2 + $0x21] sm:$0xff]  ;;  %403 = vst.msk [vmem:[#allocation2 + $0xb1] sm:$0xff] %vm347_vm0, %v328_v62  ;;  %404 = vst.msk [vmem:[#allocation2 + $0xc1] sm:$0xff] %vm347_vm0, %v329_v63  ;;  %v333_v19 = vadd.f32 %v2441_v2, %v294_v9  ;;  %2172 = vmatprep.subr.bf16.mxu1 %v2228_v51  ;;  %2135 = vmatpush3.bf16.msra.mxu0 %v2228_v51  ;;  %v297_v57 = vmul.f32 %v2429_v1, %v258_v55 }
  0x29   : > { %v617_v7 = vld [vmem:[#allocation2 + $0x1a] sm:$0xff]  ;;  %v519_v11 = vpack.c.bf16 %v489_v6, %v488_v5  ;;  %v618_v12 = vld [vmem:[#allocation2 + $0x22] sm:$0xff]  ;;  %405 = vst.msk [vmem:[#allocation2 + $0xc9] sm:$0xff] %vm347_vm0, %v330_v3  ;;  %406 = vst.msk [vmem:[#allocation2 + $0xd9] sm:$0xff] %vm347_vm0, %v331_v4  ;;  %v334_v20 = vadd.f32 %v2441_v2, %v295_v10  ;;  %2175 = vmatpush3.bf16.msra.mxu1 %v2228_v51  ;;  %2136 = vmatprep.subr.bf16.mxu0 %v2229_v53  ;;  %v1606_v6 = vsel %vm1604_vm3, %v2230_v59, 0 }
  0x2a   : > { %v744_v13 = vld [vmem:[#allocation2 + $0x18] sm:$0xff]  ;;  %v745_v14 = vld [vmem:[#allocation2 + $0x20] sm:$0xff]  ;;  %v648_v15 = vpack.c.bf16 %v618_v12, %v617_v7  ;;  %v746_v17 = vld [vmem:[#allocation2 + $0x30] sm:$0xff]  ;;  %407 = vst.msk [vmem:[#allocation2 + $0xe1] sm:$0xff] %vm347_vm0, %v332_v8  ;;  %v335_v58 = vadd.f32 %v2441_v2, %v296_v56  ;;  %v336_v62 = vadd.f32 %v2441_v2, %v297_v57  ;;  %2173 = vmatprep.subr.bf16.mxu1 %v2229_v53 }
  0x2b   : > { %v776_v16 = vpack.c.bf16 %v745_v14, %v744_v13  ;;  %v747_v18 = vld [vmem:[#allocation2 + $0x38] sm:$0xff]  ;;  %552 = vrot.lane.b32.xlu0 %v519_v11, %s2296_s14  ;;  %v1134_v22 = vld [vmem:[#allocation2 + $0x48] sm:$0xff]  ;;  %v1135_v23 = vld [vmem:[#allocation2 + $0x50] sm:$0xff]  ;;  %408 = vst.msk [vmem:[#allocation2 + $0xf1] sm:$0xff] %vm347_vm0, %v333_v19  ;;  %v299_v4 = vmul.f32 %v2429_v1, %v260_v0 }
  0x2c   : > { %v777_v21 = vpack.c.bf16 %v747_v18, %v746_v17  ;;  %681 = vrot.lane.b32.xlu1 %v648_v15, %s2297_s15  ;;  %409 = vst.msk [vmem:[#allocation2 + $0xf9] sm:$0xff] %vm347_vm0, %v334_v20  ;;  %v875_v24 = vld [vmem:[#allocation2 + $0x31] sm:$0xff]  ;;  %v876_v25 = vld [vmem:[#allocation2 + $0x39] sm:$0xff]  ;;  %v2529_v26 = vpack.c.bf16 %v1135_v23, %v1134_v22  ;;  %v751_v28 = vld [vmem:[#allocation2 + $0x68] sm:$0xff]  ;;  %2137 = vmatpush3.bf16.msra.mxu0 %v2229_v53 }
  0x2d   : > { %471 = vst.msk [vmem:[#allocation3 + $0x8] sm:$0xff] %vm347_vm0, %v776_v16  ;;  %v750_v27 = vld [vmem:[#allocation2 + $0x60] sm:$0xff]  ;;  %v2538_v30 = vpack.c.bf16 %v876_v25, %v875_v24  ;;  %v1138_v31 = vld [vmem:[#allocation2 + $0x78] sm:$0xff]  ;;  %v754_v36 = vld [vmem:[#allocation2 + $0x90] sm:$0xff]  ;;  %2176 = vmatpush3.bf16.msra.mxu1 %v2229_v53  ;;  %2178 = vmatprep.subr.msk.bf16.mxu0 %vm1604_vm3, %v2230_v59  ;;  %v338_v8 = vadd.f32 %v2441_v2, %v299_v4 }
  0x2e   : > { %472 = vst.msk [vmem:[#allocation3 + $0x10] sm:$0xff] %vm347_vm0, %v777_v21  ;;  %v2533_v29 = vpack.c.bf16 %v751_v28, %v750_v27  ;;  %473 = vst.msk [vmem:[#allocation3 + $0x18] sm:$0xff] %vm347_vm0, %v2529_v26  ;;  %v1139_v32 = vld [vmem:[#allocation2 + $0x80] sm:$0xff]  ;;  %v1004_v33 = vld [vmem:[#allocation2 + $0x32] sm:$0xff]  ;;  %2179 = vmatprep.subr.msk.bf16.mxu1 %vm1604_vm3, %v2230_v59 }
  0x2f   : > { %808 = vrot.lane.b32.xlu0 %v776_v16, %s2298_s16  ;;  %v1005_v34 = vld [vmem:[#allocation2 + $0x3a] sm:$0xff]  ;;  %v2540_v35 = vpack.c.bf16 %v1139_v32, %v1138_v31  ;;  %v1142_v40 = vld [vmem:[#allocation2 + $0xa8] sm:$0xff]  ;;  %v1143_v41 = vld [vmem:[#allocation2 + $0xb0] sm:$0xff]  ;;  %410 = vst.msk [vmem:[#allocation2 + $0x109] sm:$0xff] %vm347_vm0, %v335_v58 }
  0x30   : > { %810 = vrot.lane.b32.xlu1 %v777_v21, %s2298_s16  ;;  %474 = vst.msk [vmem:[#allocation3 + $0x20] sm:$0xff] %vm347_vm0, %v2533_v29  ;;  %v755_v37 = vld [vmem:[#allocation2 + $0x98] sm:$0xff]  ;;  %v2551_v39 = vpack.c.bf16 %v1005_v34, %v1004_v33  ;;  %v2553_v42 = vpack.c.bf16 %v1143_v41, %v1142_v40  ;;  %v1263_v45 = vld [vmem:[#allocation2 + $0x49] sm:$0xff]  ;;  %411 = vst.msk [vmem:[#allocation2 + $0x111] sm:$0xff] %vm347_vm0, %v336_v62  ;;  %2139 = vmatpush3.bf16.msra.mxu0 %v1606_v6 }
  0x31   : > { %v2545_v38 = vpack.c.bf16 %v755_v37, %v754_v36  ;;  %475 = vst.msk [vmem:[#allocation3 + $0x28] sm:$0xff] %vm347_vm0, %v2540_v35  ;;  %v1146_v43 = vld [vmem:[#allocation2 + $0xd8] sm:$0xff]  ;;  %v1147_v44 = vld [vmem:[#allocation2 + $0xe0] sm:$0xff]  ;;  %v1392_v60 = vld [vmem:[#allocation2 + $0x4a] sm:$0xff]  ;;  %2177 = vmatpush3.bf16.msra.mxu1 %v1606_v6 }
  0x32   : > { %477 = vst.msk [vmem:[#allocation3 + $0x38] sm:$0xff] %vm347_vm0, %v2553_v42  ;;  %v1264_v46 = vld [vmem:[#allocation2 + $0x51] sm:$0xff]  ;;  %v2562_v47 = vpack.c.bf16 %v1147_v44, %v1146_v43  ;;  %413 = vst.msk [vmem:[#allocation2 + $0x129] sm:$0xff] %vm347_vm0, %v338_v8  ;;  %v879_v12 = vld [vmem:[#allocation2 + $0x61] sm:$0xff] }
  0x33   : > { %937 = vrot.lane.b32.xlu0 %v519_v11, %s2299_s17  ;;  %476 = vst.msk [vmem:[#allocation3 + $0x30] sm:$0xff] %vm347_vm0, %v2545_v38  ;;  %v762_v48 = vld [vmem:[#allocation2 + $0xf0] sm:$0xff]  ;;  %v763_v49 = vld [vmem:[#allocation2 + $0xf8] sm:$0xff]  ;;  %v2574_v52 = vpack.c.bf16 %v1264_v46, %v1263_v45  ;;  %v261_v16 = vld [vmem:[%s2436_s11 + $0xc0] sm:$0xff] }
  0x34   : > { %939 = vrot.lane.b32.xlu1 %v2538_v30, %s2299_s17  ;;  %v2565_v50 = vpack.c.bf16 %v763_v49, %v762_v48  ;;  %479 = vst.msk [vmem:[#allocation3 + $0x48] sm:$0xff] %vm347_vm0, %v2562_v47  ;;  %v1393_v61 = vld [vmem:[#allocation2 + $0x52] sm:$0xff]  ;;  %v880_v13 = vld [vmem:[#allocation2 + $0x69] sm:$0xff]  ;;  %v300_v19 = vmul.f32 %v2429_v1, %v261_v16  ;;  %v1268_v28 = vld [vmem:[#allocation2 + $0x81] sm:$0xff] }
  0x35   : > { %v259_v63 = vld [vmem:[%s2436_s11 + $0xb0] sm:$0xff]  ;;  %v1423_v5 = vpack.c.bf16 %v1393_v61, %v1392_v60  ;;  %v262_v18 = vld [vmem:[%s2436_s11 + $0xc8] sm:$0xff]  ;;  %v1267_v27 = vld [vmem:[#allocation2 + $0x79] sm:$0xff] }
  0x36   : > { %480 = vst.msk [vmem:[#allocation3 + $0x50] sm:$0xff] %vm347_vm0, %v2565_v50  ;;  %v298_v3 = vmul.f32 %v2429_v1, %v259_v63  ;;  %v1150_v9 = vld [vmem:[#allocation2 + $0x108] sm:$0xff]  ;;  %v301_v20 = vmul.f32 %v2429_v1, %v262_v18  ;;  %v339_v22 = vadd.f32 %v2441_v2, %v300_v19  ;;  %v1296_v33 = vpack.c.bf16 %v1268_v28, %v1267_v27  ;;  %v1396_v34 = vld [vmem:[#allocation2 + $0x7a] sm:$0xff]  ;;  %v263_v37 = vld [vmem:[%s2436_s11 + $0xd0] sm:$0xff] }
  0x37   : > { %1066 = vrot.lane.b32.xlu0 %v648_v15, %s2300_s23  ;;  %v1151_v10 = vld [vmem:[#allocation2 + $0x110] sm:$0xff]  ;;  %v1008_v23 = vld [vmem:[#allocation2 + $0x62] sm:$0xff]  ;;  %v302_v40 = vmul.f32 %v2429_v1, %v263_v37  ;;  %v884_v46 = vld [vmem:[#allocation2 + $0x99] sm:$0xff] }
  0x38   : > { %1068 = vrot.lane.b32.xlu1 %v2551_v39, %s2300_s23  ;;  %v337_v7 = vadd.f32 %v2441_v2, %v298_v3  ;;  %v2614_v11 = vpack.c.bf16 %v1151_v10, %v1150_v9  ;;  %v1009_v24 = vld [vmem:[#allocation2 + $0x6a] sm:$0xff]  ;;  %v340_v25 = vadd.f32 %v2441_v2, %v301_v20  ;;  %414 = vst.msk [vmem:[#allocation2 + $0x139] sm:$0xff] %vm347_vm0, %v339_v22  ;;  %v1397_v36 = vld [vmem:[#allocation2 + $0x82] sm:$0xff]  ;;  %v1012_v58 = vld [vmem:[#allocation2 + $0x92] sm:$0xff] }
  0x39   : > { %v1425_v41 = vpack.c.bf16 %v1397_v36, %v1396_v34  ;;  %v341_v43 = vadd.f32 %v2441_v2, %v302_v40  ;;  %v883_v45 = vld [vmem:[#allocation2 + $0x91] sm:$0xff]  ;;  %v265_v51 = vld [vmem:[%s2436_s11 + $0xe0] sm:$0xff]  ;;  %v266_v53 = vld [vmem:[%s2436_s11 + $0xe8] sm:$0xff] }
  0x3a   : > { %412 = vst.msk [vmem:[#allocation2 + $0x121] sm:$0xff] %vm347_vm0, %v337_v7  ;;  %481 = vst.msk [vmem:[#allocation3 + $0x58] sm:$0xff] %vm347_vm0, %v2614_v11  ;;  %v304_v54 = vmul.f32 %v2429_v1, %v265_v51  ;;  %v305_v55 = vmul.f32 %v2429_v1, %v266_v53  ;;  %v910_v56 = vpack.c.bf16 %v884_v46, %v883_v45  ;;  %v1013_v59 = vld [vmem:[#allocation2 + $0x9a] sm:$0xff]  ;;  %v1271_v61 = vld [vmem:[#allocation2 + $0xa9] sm:$0xff] }
  0x3b   : > { %1196 = vrot.lane.b32.xlu0 %v777_v21, %s2301_s25  ;;  %v908_v21 = vpack.c.bf16 %v880_v13, %v879_v12  ;;  %415 = vst.msk [vmem:[#allocation2 + $0x141] sm:$0xff] %vm347_vm0, %v340_v25  ;;  %416 = vst.msk [vmem:[#allocation2 + $0x151] sm:$0xff] %vm347_vm0, %v341_v43  ;;  %v1272_v62 = vld [vmem:[#allocation2 + $0xb1] sm:$0xff]  ;;  %v887_v16 = vld [vmem:[#allocation2 + $0xc1] sm:$0xff] }
  0x3c   : > { %1198 = vrot.lane.b32.xlu1 %v2529_v26, %s2301_s25  ;;  %v343_v57 = vadd.f32 %v2441_v2, %v304_v54  ;;  %v344_v60 = vadd.f32 %v2441_v2, %v305_v55  ;;  %v1298_v4 = vpack.c.bf16 %v1272_v62, %v1271_v61  ;;  %v1401_v6 = vld [vmem:[#allocation2 + $0xb2] sm:$0xff]  ;;  %v888_v18 = vld [vmem:[#allocation2 + $0xc9] sm:$0xff]  ;;  %v1276_v27 = vld [vmem:[#allocation2 + $0xe1] sm:$0xff] }
  0x3d   : > { %v267_v7 = vld [vmem:[%s2436_s11 + $0xf0] sm:$0xff]  ;;  %v268_v8 = vld [vmem:[%s2436_s11 + $0xf8] sm:$0xff]  ;;  %v1016_v19 = vld [vmem:[#allocation2 + $0xc2] sm:$0xff] }
  0x3e   : > { %418 = vst.msk [vmem:[#allocation2 + $0x169] sm:$0xff] %vm347_vm0, %v343_v57  ;;  %419 = vst.msk [vmem:[#allocation2 + $0x171] sm:$0xff] %vm347_vm0, %v344_v60  ;;  %v306_v9 = vmul.f32 %v2429_v1, %v267_v7  ;;  %v1017_v20 = vld [vmem:[#allocation2 + $0xca] sm:$0xff]  ;;  %v1405_v34 = vld [vmem:[#allocation2 + $0xe2] sm:$0xff] }
  0x3f   : > { %1325 = vrot.lane.b32.xlu0 %v2538_v30, %s2302_s10  ;;  %v1041_v25 = vpack.c.bf16 %v1017_v20, %v1016_v19  ;;  %v891_v45 = vld [vmem:[#allocation2 + $0xf1] sm:$0xff]  ;;  %v892_v46 = vld [vmem:[#allocation2 + $0xf9] sm:$0xff] }
  0x40   : > { %1327 = vrot.lane.b32.xlu1 %v2574_v52, %s2302_s10  ;;  %v345_v12 = vadd.f32 %v2441_v2, %v306_v9  ;;  %v1020_v53 = vld [vmem:[#allocation2 + $0xf2] sm:$0xff]  ;;  %v1021_v54 = vld [vmem:[#allocation2 + $0xfa] sm:$0xff]  ;;  %v1025_v19 = vld [vmem:[#allocation2 + $0x12a] sm:$0xff] }
  0x41   : > { %v766_v14 = vld [vmem:[#allocation2 + $0x120] sm:$0xff]  ;;  %v767_v15 = vld [vmem:[#allocation2 + $0x128] sm:$0xff]  ;;  %v1280_v60 = vld [vmem:[#allocation2 + $0x111] sm:$0xff] }
  0x42   : > { %v2622_v17 = vpack.c.bf16 %v767_v15, %v766_v14  ;;  %v1155_v31 = vld [vmem:[#allocation2 + $0x140] sm:$0xff]  ;;  %v770_v48 = vld [vmem:[#allocation2 + $0x150] sm:$0xff]  ;;  %420 = vst.msk [vmem:[#allocation2 + $0x181] sm:$0xff] %vm347_vm0, %v345_v12  ;;  %v759_v15 = vld [vmem:[#allocation2 + $0xc8] sm:$0xff] }
  0x43   : > { %1454 = vrot.lane.b32.xlu0 %v2551_v39, %s2303_s26  ;;  %v758_v14 = vld [vmem:[#allocation2 + $0xc0] sm:$0xff] }
  0x44   : > { %554 = vrot.lane.b32.xlu1 %v2538_v30, %s2296_s14  ;;  %482 = vst.msk [vmem:[#allocation3 + $0x60] sm:$0xff] %vm347_vm0, %v2622_v17  ;;  %v1154_v30 = vld [vmem:[#allocation2 + $0x138] sm:$0xff] }
  0x45   : > { %v2644_v32 = vpack.c.bf16 %v1155_v31, %v1154_v30  ;;  %v1158_v63 = vld [vmem:[#allocation2 + $0x168] sm:$0xff]  ;;  %v1159_v0 = vld [vmem:[#allocation2 + $0x170] sm:$0xff] }
  0x46   : > { %v2688_v3 = vpack.c.bf16 %v1159_v0, %v1158_v63 }
  0x47   : > { %1456 = vrot.lane.b32.xlu0 %v1423_v5, %s2303_s26  ;;  %483 = vst.msk [vmem:[#allocation3 + $0x68] sm:$0xff] %vm347_vm0, %v2644_v32 }
  0x48   : > { %556 = vrot.lane.b32.xlu1 %v2574_v52, %s2296_s14  ;;  %485 = vst.msk [vmem:[#allocation3 + $0x78] sm:$0xff] %vm347_vm0, %v2688_v3 }
  0x4b   : > { %683 = vrot.lane.b32.xlu0 %v2551_v39, %s2297_s15  ;;  %v264_v39 = vld [vmem:[%s2436_s11 + $0xd8] sm:$0xff] }
  0x4c   : > { %685 = vrot.lane.b32.xlu1 %v1423_v5, %s2297_s15 }
  0x4f   : > { %812 = vrot.lane.b32.xlu0 %v2529_v26, %s2298_s16  ;;  %v1037_v26 = vpack.c.bf16 %v1009_v24, %v1008_v23  ;;  %v438_v23 = vld [vmem:[#allocation2 + $0xc0] sm:$0xff]  ;;  %v439_v24 = vld [vmem:[#allocation2 + $0xc8] sm:$0xff] }
  0x50   : > { %814 = vrot.lane.b32.xlu1 %v2533_v29, %s2298_s16 }
  0x53   : > { %941 = vrot.lane.b32.xlu0 %v2574_v52, %s2299_s17 }
  0x54   : > { %943 = vrot.lane.b32.xlu1 %v908_v21, %s2299_s17 }
  0x57   : > { %1070 = vrot.lane.b32.xlu0 %v1423_v5, %s2300_s23  ;;  %v1400_v5 = vld [vmem:[#allocation2 + $0xaa] sm:$0xff] }
  0x58   : > { %1072 = vrot.lane.b32.xlu1 %v1037_v26, %s2300_s23  ;;  %v1427_v10 = vpack.c.bf16 %v1401_v6, %v1400_v5 }
  0x5b   : > { %1200 = vrot.lane.b32.xlu0 %v2533_v29, %s2301_s25  ;;  %v303_v29 = vmul.f32 %v2429_v1, %v264_v39 }
  0x5c   : > { %1202 = vrot.lane.b32.xlu1 %v2540_v35, %s2301_s25 }
  0x5d   : > { %v342_v44 = vadd.f32 %v2441_v2, %v303_v29 }
  0x5f   : > { %1329 = vrot.lane.b32.xlu0 %v908_v21, %s2302_s10  ;;  %417 = vst.msk [vmem:[#allocation2 + $0x159] sm:$0xff] %vm347_vm0, %v342_v44 }
  0x60   : > { %1331 = vrot.lane.b32.xlu1 %v1296_v33, %s2302_s10 }
  0x63   : > { %1458 = vrot.lane.b32.xlu0 %v1037_v26, %s2303_s26 }
  0x64   : > { %558 = vrot.lane.b32.xlu1 %v908_v21, %s2296_s14 }
  0x66   : > { %v771_v49 = vld [vmem:[#allocation2 + $0x158] sm:$0xff] }
  0x67   : > { %1460 = vrot.lane.b32.xlu0 %v1425_v41, %s2303_s26  ;;  %v2667_v52 = vpack.c.bf16 %v771_v49, %v770_v48  ;;  %v914_v49 = vpack.c.bf16 %v892_v46, %v891_v45  ;;  %v900_v45 = vld [vmem:[#allocation2 + $0x159] sm:$0xff] }
  0x68   : > { %560 = vrot.lane.b32.xlu1 %v1296_v33, %s2296_s14 }
  0x69   : > { %484 = vst.msk [vmem:[#allocation3 + $0x70] sm:$0xff] %vm347_vm0, %v2667_v52 }
  0x6b   : > { %687 = vrot.lane.b32.xlu0 %v1037_v26, %s2297_s15  ;;  %v1275_v26 = vld [vmem:[#allocation2 + $0xd9] sm:$0xff] }
  0x6c   : > { %689 = vrot.lane.b32.xlu1 %v1425_v41, %s2297_s15  ;;  %v1300_v28 = vpack.c.bf16 %v1276_v27, %v1275_v26 }
  0x6f   : > { %816 = vrot.lane.b32.xlu0 %v2540_v35, %s2298_s16  ;;  %v1039_v35 = vpack.c.bf16 %v1013_v59, %v1012_v58  ;;  %v1279_v59 = vld [vmem:[#allocation2 + $0x109] sm:$0xff] }
  0x70   : > { %818 = vrot.lane.b32.xlu1 %v2545_v38, %s2298_s16  ;;  %v1302_v61 = vpack.c.bf16 %v1280_v60, %v1279_v59 }
  0x73   : > { %945 = vrot.lane.b32.xlu0 %v1296_v33, %s2299_s17  ;;  %v1404_v33 = vld [vmem:[#allocation2 + $0xda] sm:$0xff] }
  0x74   : > { %947 = vrot.lane.b32.xlu1 %v910_v56, %s2299_s17  ;;  %v1429_v39 = vpack.c.bf16 %v1405_v34, %v1404_v33  ;;  %v1413_v33 = vld [vmem:[#allocation2 + $0x142] sm:$0xff] }
  0x77   : > { %1074 = vrot.lane.b32.xlu0 %v1425_v41, %s2300_s23 }
  0x78   : > { %1076 = vrot.lane.b32.xlu1 %v1039_v35, %s2300_s23 }
  0x7b   : > { %1204 = vrot.lane.b32.xlu0 %v2545_v38, %s2301_s25  ;;  %v307_v38 = vmul.f32 %v2429_v1, %v268_v8  ;;  %v783_v1 = vpack.c.bf16 %v759_v15, %v758_v14  ;;  %v895_v14 = vld [vmem:[#allocation2 + $0x121] sm:$0xff]  ;;  %v896_v15 = vld [vmem:[#allocation2 + $0x129] sm:$0xff] }
  0x7c   : > { %1206 = vrot.lane.b32.xlu1 %v2553_v42, %s2301_s25 }
  0x7d   : > { %v346_v13 = vadd.f32 %v2441_v2, %v307_v38  ;;  %v912_v2 = vpack.c.bf16 %v888_v18, %v887_v16  ;;  %v916_v16 = vpack.c.bf16 %v896_v15, %v895_v14  ;;  %v903_v14 = vld [vmem:[#allocation2 + $0x181] sm:$0xff] }
  0x7f   : > { %1333 = vrot.lane.b32.xlu0 %v910_v56, %s2302_s10  ;;  %421 = vst.msk [vmem:[#allocation2 + $0x189] sm:$0xff] %vm347_vm0, %v346_v13 }
  0x80   : > { %1335 = vrot.lane.b32.xlu1 %v1298_v4, %s2302_s10 }
  0x83   : > { %1462 = vrot.lane.b32.xlu0 %v1039_v35, %s2303_s26 }
  0x84   : > { %562 = vrot.lane.b32.xlu1 %v910_v56, %s2296_s14  ;;  %v1043_v56 = vpack.c.bf16 %v1021_v54, %v1020_v53  ;;  %v1029_v53 = vld [vmem:[#allocation2 + $0x15a] sm:$0xff] }
  0x86   : > { %v904_v15 = vld [vmem:[#allocation2 + $0x189] sm:$0xff] }
  0x87   : > { %1464 = vrot.lane.b32.xlu0 %v1427_v10, %s2303_s26 }
  0x88   : > { %564 = vrot.lane.b32.xlu1 %v1298_v4, %s2296_s14 }
  0x8b   : > { %691 = vrot.lane.b32.xlu0 %v1039_v35, %s2297_s15  ;;  %v551_v21 = vpop.permute.xlu0 %550 }
  0x8c   : > { %693 = vrot.lane.b32.xlu1 %v1427_v10, %s2297_s15  ;;  %599 = vst.msk [vmem:[#allocation3] sm:$0xff] %vm598_vm4, %v551_v21 }
  0x8d   : > { %v680_v22 = vpop.permute.xlu1 %679 }
  0x8e   : > { %728 = vst.msk [vmem:[#allocation3] sm:$0xff] %vm727_vm5, %v680_v22 }
  0x8f   : > { %820 = vrot.lane.b32.xlu0 %v2553_v42, %s2298_s16  ;;  %v462_v42 = vpack.c.bf16 %v439_v24, %v438_v23  ;;  %v1283_v24 = vld [vmem:[#allocation2 + $0x139] sm:$0xff] }
  0x90   : > { %822 = vrot.lane.b32.xlu1 %v783_v1, %s2298_s16 }
  0x91   : > { %478 = vst.msk [vmem:[#allocation3 + $0x40] sm:$0xff] %vm347_vm0, %v462_v42 }
  0x93   : > { %949 = vrot.lane.b32.xlu0 %v1298_v4, %s2299_s17  ;;  %v1408_v4 = vld [vmem:[#allocation2 + $0x10a] sm:$0xff] }
  0x94   : > { %951 = vrot.lane.b32.xlu1 %v912_v2, %s2299_s17 }
  0x97   : > { %1078 = vrot.lane.b32.xlu0 %v1427_v10, %s2300_s23 }
  0x98   : > { %1080 = vrot.lane.b32.xlu1 %v1041_v25, %s2300_s23 }
  0x9b   : > { %1208 = vrot.lane.b32.xlu0 %v783_v1, %s2301_s25 }
  0x9c   : > { %1210 = vrot.lane.b32.xlu1 %v2562_v47, %s2301_s25 }
  0x9d   : > { %v553_v30 = vpop.permute.xlu0 %552 }
  0x9e   : > { %600 = vst.msk [vmem:[#allocation3 + $0x8] sm:$0xff] %vm598_vm4, %v553_v30  ;;  %v682_v31 = vpop.permute.xlu1 %681 }
  0x9f   : > { %729 = vst.msk [vmem:[#allocation3 + $0x8] sm:$0xff] %vm727_vm5, %v682_v31  ;;  %1337 = vrot.lane.b32.xlu0 %v912_v2, %s2302_s10  ;;  %v1412_v31 = vld [vmem:[#allocation2 + $0x13a] sm:$0xff] }
  0xa0   : > { %1339 = vrot.lane.b32.xlu1 %v1300_v28, %s2302_s10 }
  0xa1   : > { %v809_v36 = vpop.permute.xlu0 %808 }
  0xa2   : > { %857 = vst.msk [vmem:[#allocation3] sm:$0xff] %vm856_vm6, %v809_v36  ;;  %v811_v37 = vpop.permute.xlu1 %810 }
  0xa3   : > { %858 = vst.msk [vmem:[#allocation3 + $0x8] sm:$0xff] %vm856_vm6, %v811_v37  ;;  %1466 = vrot.lane.b32.xlu0 %v1041_v25, %s2303_s26  ;;  %v1433_v37 = vpack.c.bf16 %v1413_v33, %v1412_v31  ;;  %v1420_v33 = vld [vmem:[#allocation2 + $0x19a] sm:$0xff] }
  0xa4   : > { %566 = vrot.lane.b32.xlu1 %v912_v2, %s2296_s14  ;;  %v1024_v2 = vld [vmem:[#allocation2 + $0x122] sm:$0xff] }
  0xa5   : > { %v938_v40 = vpop.permute.xlu0 %937  ;;  %v1045_v21 = vpack.c.bf16 %v1025_v19, %v1024_v2  ;;  %v1032_v2 = vld [vmem:[#allocation2 + $0x182] sm:$0xff]  ;;  %v1033_v19 = vld [vmem:[#allocation2 + $0x18a] sm:$0xff] }
  0xa6   : > { %986 = vst.msk [vmem:[#allocation3] sm:$0xff] %vm985_vm7, %v938_v40  ;;  %v940_v29 = vpop.permute.xlu1 %939 }
  0xa7   : > { %987 = vst.msk [vmem:[#allocation3 + $0x8] sm:$0xff] %vm985_vm7, %v940_v29  ;;  %1468 = vrot.lane.b32.xlu0 %v1429_v39, %s2303_s26 }
  0xa8   : > { %568 = vrot.lane.b32.xlu1 %v1300_v28, %s2296_s14 }
  0xa9   : > { %v1067_v41 = vpop.permute.xlu0 %1066 }
  0xaa   : > { %1115 = vst.msk [vmem:[#allocation3] sm:$0xff] %vm1114_vm8, %v1067_v41  ;;  %v1069_v43 = vpop.permute.xlu1 %1068 }
  0xab   : > { %1116 = vst.msk [vmem:[#allocation3 + $0x8] sm:$0xff] %vm1114_vm8, %v1069_v43  ;;  %695 = vrot.lane.b32.xlu0 %v1041_v25, %s2297_s15  ;;  %v1284_v25 = vld [vmem:[#allocation2 + $0x141] sm:$0xff] }
  0xac   : > { %697 = vrot.lane.b32.xlu1 %v1429_v39, %s2297_s15  ;;  %v1304_v26 = vpack.c.bf16 %v1284_v25, %v1283_v24 }
  0xad   : > { %v1197_v44 = vpop.permute.xlu0 %1196 }
  0xae   : > { %1245 = vst.msk [vmem:[#allocation3] sm:$0xff] %vm1244_vm9, %v1197_v44  ;;  %v1199_v48 = vpop.permute.xlu1 %1198  ;;  %v899_v44 = vld [vmem:[#allocation2 + $0x151] sm:$0xff] }
  0xaf   : > { %1246 = vst.msk [vmem:[#allocation3 + $0x8] sm:$0xff] %vm1244_vm9, %v1199_v48  ;;  %824 = vrot.lane.b32.xlu0 %v2562_v47, %s2298_s16  ;;  %v918_v48 = vpack.c.bf16 %v900_v45, %v899_v44 }
  0xb0   : > { %826 = vrot.lane.b32.xlu1 %v2565_v50, %s2298_s16 }
  0xb1   : > { %v1326_v51 = vpop.permute.xlu0 %1325 }
  0xb2   : > { %1374 = vst.msk [vmem:[#allocation3] sm:$0xff] %vm1373_vm10, %v1326_v51  ;;  %v1328_v55 = vpop.permute.xlu1 %1327  ;;  %v1028_v51 = vld [vmem:[#allocation2 + $0x152] sm:$0xff] }
  0xb3   : > { %1375 = vst.msk [vmem:[#allocation3 + $0x8] sm:$0xff] %vm1373_vm10, %v1328_v55  ;;  %953 = vrot.lane.b32.xlu0 %v1300_v28, %s2299_s17  ;;  %v1047_v55 = vpack.c.bf16 %v1029_v53, %v1028_v51 }
  0xb4   : > { %955 = vrot.lane.b32.xlu1 %v914_v49, %s2299_s17 }
  0xb5   : > { %v1455_v47 = vpop.permute.xlu0 %1454 }
  0xb6   : > { %1503 = vst.msk [vmem:[#allocation3] sm:$0xff] %vm1502_vm11, %v1455_v47  ;;  %v555_v57 = vpop.permute.xlu1 %554 }
  0xb7   : > { %601 = vst.msk [vmem:[#allocation3 + $0x10] sm:$0xff] %vm598_vm4, %v555_v57  ;;  %1082 = vrot.lane.b32.xlu0 %v1429_v39, %s2300_s23  ;;  %v1287_v57 = vld [vmem:[#allocation2 + $0x169] sm:$0xff] }
  0xb8   : > { %1084 = vrot.lane.b32.xlu1 %v1043_v56, %s2300_s23 }
  0xb9   : > { %v1457_v58 = vpop.permute.xlu0 %1456 }
  0xba   : > { %1504 = vst.msk [vmem:[#allocation3 + $0x8] sm:$0xff] %vm1502_vm11, %v1457_v58  ;;  %v557_v35 = vpop.permute.xlu1 %556  ;;  %v1288_v58 = vld [vmem:[#allocation2 + $0x171] sm:$0xff] }
  0xbb   : > { %602 = vst.msk [vmem:[#allocation3 + $0x18] sm:$0xff] %vm598_vm4, %v557_v35  ;;  %1212 = vrot.lane.b32.xlu0 %v2565_v50, %s2301_s25  ;;  %v1409_v50 = vld [vmem:[#allocation2 + $0x112] sm:$0xff]  ;;  %v1306_v60 = vpack.c.bf16 %v1288_v58, %v1287_v57 }
  0xbc   : > { %1214 = vrot.lane.b32.xlu1 %v2614_v11, %s2301_s25  ;;  %v1431_v8 = vpack.c.bf16 %v1409_v50, %v1408_v4 }
  0xbd   : > { %v684_v62 = vpop.permute.xlu0 %683  ;;  %v1519_v63 = vld [vmem:[#allocation3] sm:$0xff] }
  0xbe   : > { %730 = vst.msk [vmem:[#allocation3 + $0x10] sm:$0xff] %vm727_vm5, %v684_v62  ;;  %v686_v0 = vpop.permute.xlu1 %685  ;;  %2140 = vmatprep.mubr.msk.bf16.mxu0 %vm1555_vm12, %v1519_v63  ;;  %v1416_v63 = vld [vmem:[#allocation2 + $0x16a] sm:$0xff] }
  0xbf   : > { %731 = vst.msk [vmem:[#allocation3 + $0x18] sm:$0xff] %vm727_vm5, %v686_v0  ;;  %1341 = vrot.lane.b32.xlu0 %v914_v49, %s2302_s10  ;;  %v1417_v0 = vld [vmem:[#allocation2 + $0x172] sm:$0xff] }
  0xc0   : > { %1343 = vrot.lane.b32.xlu1 %v1302_v61, %s2302_s10 }
  0xc1   : > { %v813_v5 = vpop.permute.xlu0 %812  ;;  %v1520_v6 = vld [vmem:[#allocation3 + $0x8] sm:$0xff] }
  0xc2   : > { %859 = vst.msk [vmem:[#allocation3 + $0x10] sm:$0xff] %vm856_vm6, %v813_v5  ;;  %v815_v7 = vpop.permute.xlu1 %814  ;;  %2141 = vmatmul.mubr.msk.bf16.vlgmr.msra.gmra.mrb[0].mxu0 %vm1555_vm12, %v1520_v6  ;;  %v1435_v5 = vpack.c.bf16 %v1417_v0, %v1416_v63 }
  0xc3   : > { %860 = vst.msk [vmem:[#allocation3 + $0x18] sm:$0xff] %vm856_vm6, %v815_v7  ;;  %1470 = vrot.lane.b32.xlu0 %v1043_v56, %s2303_s26 }
  0xc4   : > { %570 = vrot.lane.b32.xlu1 %v914_v49, %s2296_s14 }
  0xc5   : > { %v942_v9 = vpop.permute.xlu0 %941 }
  0xc6   : > { %988 = vst.msk [vmem:[#allocation3 + $0x10] sm:$0xff] %vm985_vm7, %v942_v9  ;;  %v944_v38 = vpop.permute.xlu1 %943  ;;  %v774_v9 = vld [vmem:[#allocation2 + $0x180] sm:$0xff] }
  0xc7   : > { %989 = vst.msk [vmem:[#allocation3 + $0x18] sm:$0xff] %vm985_vm7, %v944_v38  ;;  %1472 = vrot.lane.b32.xlu0 %v1431_v8, %s2303_s26  ;;  %v775_v38 = vld [vmem:[#allocation2 + $0x188] sm:$0xff] }
  0xc8   : > { %572 = vrot.lane.b32.xlu1 %v1302_v61, %s2296_s14 }
  0xc9   : > { %v1071_v10 = vpop.permute.xlu0 %1070 }
  0xca   : > { %1117 = vst.msk [vmem:[#allocation3 + $0x10] sm:$0xff] %vm1114_vm8, %v1071_v10  ;;  %v1073_v12 = vpop.permute.xlu1 %1072 }
  0xcb   : > { %1118 = vst.msk [vmem:[#allocation3 + $0x18] sm:$0xff] %vm1114_vm8, %v1073_v12  ;;  %699 = vrot.lane.b32.xlu0 %v1043_v56, %s2297_s15  ;;  %v791_v12 = vpack.c.bf16 %v775_v38, %v774_v9 }
  0xcc   : > { %701 = vrot.lane.b32.xlu1 %v1431_v8, %s2297_s15 }
  0xcd   : > { %v1201_v13 = vpop.permute.xlu0 %1200 }
  0xce   : > { %1247 = vst.msk [vmem:[#allocation3 + $0x10] sm:$0xff] %vm1244_vm9, %v1201_v13  ;;  %v1203_v1 = vpop.permute.xlu1 %1202 }
  0xcf   : > { %1248 = vst.msk [vmem:[#allocation3 + $0x18] sm:$0xff] %vm1244_vm9, %v1203_v1  ;;  %828 = vrot.lane.b32.xlu0 %v2614_v11, %s2298_s16 }
  0xd0   : > { %830 = vrot.lane.b32.xlu1 %v2622_v17, %s2298_s16 }
  0xd1   : > { %v1330_v18 = vpop.permute.xlu0 %1329 }
  0xd2   : > { %1376 = vst.msk [vmem:[#allocation3 + $0x10] sm:$0xff] %vm1373_vm10, %v1330_v18  ;;  %v1332_v20 = vpop.permute.xlu1 %1331 }
  0xd3   : > { %1377 = vst.msk [vmem:[#allocation3 + $0x18] sm:$0xff] %vm1373_vm10, %v1332_v20  ;;  %957 = vrot.lane.b32.xlu0 %v1302_v61, %s2299_s17 }
  0xd4   : > { %959 = vrot.lane.b32.xlu1 %v916_v16, %s2299_s17 }
  0xd5   : > { %v1459_v22 = vpop.permute.xlu0 %1458 }
  0xd6   : > { %1505 = vst.msk [vmem:[#allocation3 + $0x10] sm:$0xff] %vm1502_vm11, %v1459_v22  ;;  %v559_v11 = vpop.permute.xlu1 %558 }
  0xd7   : > { %603 = vst.msk [vmem:[#allocation3 + $0x20] sm:$0xff] %vm598_vm4, %v559_v11  ;;  %1086 = vrot.lane.b32.xlu0 %v1431_v8, %s2300_s23  ;;  %v1162_v11 = vld [vmem:[#allocation2 + $0x198] sm:$0xff] }
  0xd8   : > { %1088 = vrot.lane.b32.xlu1 %v1045_v21, %s2300_s23 }
  0xd9   : > { %v1461_v23 = vpop.permute.xlu0 %1460 }
  0xda   : > { %1506 = vst.msk [vmem:[#allocation3 + $0x18] sm:$0xff] %vm1502_vm11, %v1461_v23  ;;  %v561_v42 = vpop.permute.xlu1 %560  ;;  %v1163_v23 = vld [vmem:[#allocation2 + $0x1a0] sm:$0xff] }
  0xdb   : > { %604 = vst.msk [vmem:[#allocation3 + $0x28] sm:$0xff] %vm598_vm4, %v561_v42  ;;  %1216 = vrot.lane.b32.xlu0 %v2622_v17, %s2301_s25  ;;  %v1179_v24 = vpack.c.bf16 %v1163_v23, %v1162_v11  ;;  %v1291_v42 = vld [vmem:[#allocation2 + $0x199] sm:$0xff] }
  0xdc   : > { %1218 = vrot.lane.b32.xlu1 %v2644_v32, %s2301_s25 }
  0xdd   : > { %v688_v27 = vpop.permute.xlu0 %687  ;;  %v1521_v28 = vld [vmem:[#allocation3 + $0x10] sm:$0xff] }
  0xde   : > { %732 = vst.msk [vmem:[#allocation3 + $0x20] sm:$0xff] %vm727_vm5, %v688_v27  ;;  %v690_v30 = vpop.permute.xlu1 %689  ;;  %2144 = vmatprep.mubr.msk.bf16.mxu0 %vm1555_vm12, %v1521_v28 }
  0xdf   : > { %733 = vst.msk [vmem:[#allocation3 + $0x28] sm:$0xff] %vm727_vm5, %v690_v30  ;;  %1345 = vrot.lane.b32.xlu0 %v916_v16, %s2302_s10 }
  0xe0   : > { %1347 = vrot.lane.b32.xlu1 %v1304_v26, %s2302_s10 }
  0xe1   : > { %v817_v17 = vpop.permute.xlu0 %816  ;;  %v1522_v34 = vld [vmem:[#allocation3 + $0x18] sm:$0xff] }
  0xe2   : > { %861 = vst.msk [vmem:[#allocation3 + $0x20] sm:$0xff] %vm856_vm6, %v817_v17  ;;  %v819_v36 = vpop.permute.xlu1 %818  ;;  %2145 = vmatmul.mubr.msk.bf16.gmra.mrb[4].mxu0 %vm1555_vm12, %v1522_v34  ;;  %v1421_v17 = vld [vmem:[#allocation2 + $0x1a2] sm:$0xff] }
  0xe3   : > { %862 = vst.msk [vmem:[#allocation3 + $0x28] sm:$0xff] %vm856_vm6, %v819_v36  ;;  %1474 = vrot.lane.b32.xlu0 %v1045_v21, %s2303_s26  ;;  %v1437_v36 = vpack.c.bf16 %v1421_v17, %v1420_v33 }
  0xe4   : > { %574 = vrot.lane.b32.xlu1 %v916_v16, %s2296_s14  ;;  %v920_v16 = vpack.c.bf16 %v904_v15, %v903_v14 }
  0xe5   : > { %v946_v39 = vpop.permute.xlu0 %945 }
  0xe6   : > { %990 = vst.msk [vmem:[#allocation3 + $0x20] sm:$0xff] %vm985_vm7, %v946_v39  ;;  %v948_v40 = vpop.permute.xlu1 %947 }
  0xe7   : > { %991 = vst.msk [vmem:[#allocation3 + $0x28] sm:$0xff] %vm985_vm7, %v948_v40  ;;  %1476 = vrot.lane.b32.xlu0 %v1433_v37, %s2303_s26 }
  0xe8   : > { %576 = vrot.lane.b32.xlu1 %v1304_v26, %s2296_s14 }
  0xe9   : > { %v1075_v29 = vpop.permute.xlu0 %1074 }
  0xea   : > { %1119 = vst.msk [vmem:[#allocation3 + $0x20] sm:$0xff] %vm1114_vm8, %v1075_v29  ;;  %v1077_v41 = vpop.permute.xlu1 %1076 }
  0xeb   : > { %1120 = vst.msk [vmem:[#allocation3 + $0x28] sm:$0xff] %vm1114_vm8, %v1077_v41  ;;  %703 = vrot.lane.b32.xlu0 %v1045_v21, %s2297_s15  ;;  %v1049_v21 = vpack.c.bf16 %v1033_v19, %v1032_v2 }
  0xec   : > { %705 = vrot.lane.b32.xlu1 %v1433_v37, %s2297_s15 }
  0xed   : > { %v1205_v43 = vpop.permute.xlu0 %1204 }
  0xee   : > { %1249 = vst.msk [vmem:[#allocation3 + $0x20] sm:$0xff] %vm1244_vm9, %v1205_v43  ;;  %v1207_v46 = vpop.permute.xlu1 %1206 }
  0xef   : > { %1250 = vst.msk [vmem:[#allocation3 + $0x28] sm:$0xff] %vm1244_vm9, %v1207_v46  ;;  %832 = vrot.lane.b32.xlu0 %v2644_v32, %s2298_s16 }
  0xf0   : > { %834 = vrot.lane.b32.xlu1 %v2667_v52, %s2298_s16 }
  0xf1   : > { %v1334_v49 = vpop.permute.xlu0 %1333 }
  0xf2   : > { %1378 = vst.msk [vmem:[#allocation3 + $0x20] sm:$0xff] %vm1373_vm10, %v1334_v49  ;;  %v1336_v54 = vpop.permute.xlu1 %1335 }
  0xf3   : > { %1379 = vst.msk [vmem:[#allocation3 + $0x28] sm:$0xff] %vm1373_vm10, %v1336_v54  ;;  %961 = vrot.lane.b32.xlu0 %v1304_v26, %s2299_s17  ;;  %v1292_v26 = vld [vmem:[#allocation2 + $0x1a1] sm:$0xff] }
  0xf4   : > { %963 = vrot.lane.b32.xlu1 %v918_v48, %s2299_s17  ;;  %v1308_v28 = vpack.c.bf16 %v1292_v26, %v1291_v42 }
  0xf5   : > { %v1463_v56 = vpop.permute.xlu0 %1462 }
  0xf6   : > { %1507 = vst.msk [vmem:[#allocation3 + $0x20] sm:$0xff] %vm1502_vm11, %v1463_v56  ;;  %v563_v32 = vpop.permute.xlu1 %562 }
  0xf7   : > { %605 = vst.msk [vmem:[#allocation3 + $0x30] sm:$0xff] %vm598_vm4, %v563_v32  ;;  %1090 = vrot.lane.b32.xlu0 %v1433_v37, %s2300_s23 }
  0xf8   : > { %1092 = vrot.lane.b32.xlu1 %v1047_v55, %s2300_s23 }
  0xf9   : > { %v1465_v47 = vpop.permute.xlu0 %1464 }
  0xfa   : > { %1508 = vst.msk [vmem:[#allocation3 + $0x28] sm:$0xff] %vm1502_vm11, %v1465_v47  ;;  %v565_v59 = vpop.permute.xlu1 %564 }
  0xfb   : > { %606 = vst.msk [vmem:[#allocation3 + $0x38] sm:$0xff] %vm598_vm4, %v565_v59  ;;  %1220 = vrot.lane.b32.xlu0 %v2667_v52, %s2301_s25 }
  0xfc   : > { %1222 = vrot.lane.b32.xlu1 %v2688_v3, %s2301_s25 }
  0xfd   : > { %v692_v35 = vpop.permute.xlu0 %691  ;;  %v1523_v61 = vld [vmem:[#allocation3 + $0x20] sm:$0xff] }
  0xfe   : > { %734 = vst.msk [vmem:[#allocation3 + $0x30] sm:$0xff] %vm727_vm5, %v692_v35  ;;  %v694_v62 = vpop.permute.xlu1 %693  ;;  %2148 = vmatprep.mubr.msk.bf16.mxu0 %vm1555_vm12, %v1523_v61 }
  0xff   : > { %735 = vst.msk [vmem:[#allocation3 + $0x38] sm:$0xff] %vm727_vm5, %v694_v62  ;;  %1349 = vrot.lane.b32.xlu0 %v918_v48, %s2302_s10 }
 0x100   : > { %1351 = vrot.lane.b32.xlu1 %v1306_v60, %s2302_s10 }
 0x101   : > { %v821_v52 = vpop.permute.xlu0 %820  ;;  %v1524_v4 = vld [vmem:[#allocation3 + $0x28] sm:$0xff] }
 0x102   : > { %863 = vst.msk [vmem:[#allocation3 + $0x30] sm:$0xff] %vm856_vm6, %v821_v52  ;;  %v823_v50 = vpop.permute.xlu1 %822  ;;  %2149 = vmatmul.mubr.msk.bf16.gmra.mrb[8].mxu0 %vm1555_vm12, %v1524_v4 }
 0x103   : > { %864 = vst.msk [vmem:[#allocation3 + $0x38] sm:$0xff] %vm856_vm6, %v823_v50  ;;  %1478 = vrot.lane.b32.xlu0 %v1047_v55, %s2303_s26 }
 0x104   : > { %578 = vrot.lane.b32.xlu1 %v918_v48, %s2296_s14 }
 0x105   : > { %v950_v6 = vpop.permute.xlu0 %949 }
 0x106   : > { %992 = vst.msk [vmem:[#allocation3 + $0x30] sm:$0xff] %vm985_vm7, %v950_v6  ;;  %v952_v7 = vpop.permute.xlu1 %951 }
 0x107   : > { %993 = vst.msk [vmem:[#allocation3 + $0x38] sm:$0xff] %vm985_vm7, %v952_v7  ;;  %1480 = vrot.lane.b32.xlu0 %v1435_v5, %s2303_s26 }
 0x108   : > { %580 = vrot.lane.b32.xlu1 %v1306_v60, %s2296_s14 }
 0x109   : > { %v1079_v8 = vpop.permute.xlu0 %1078 }
 0x10a   : > { %1121 = vst.msk [vmem:[#allocation3 + $0x30] sm:$0xff] %vm1114_vm8, %v1079_v8  ;;  %v1081_v10 = vpop.permute.xlu1 %1080 }
 0x10b   : > { %1122 = vst.msk [vmem:[#allocation3 + $0x38] sm:$0xff] %vm1114_vm8, %v1081_v10  ;;  %707 = vrot.lane.b32.xlu0 %v1047_v55, %s2297_s15 }
 0x10c   : > { %709 = vrot.lane.b32.xlu1 %v1435_v5, %s2297_s15  ;;  %s2947_s15 = scalar_lea.vmem %s3134_s4, %s2113_s6  ;;  %s2083_s6 = sshll.u32 %s223_s30, 1 }
 0x10d   : > { %v1209_v13 = vpop.permute.xlu0 %1208 }
 0x10e   : > { %1251 = vst.msk [vmem:[#allocation3 + $0x30] sm:$0xff] %vm1244_vm9, %v1209_v13  ;;  %v1211_v1 = vpop.permute.xlu1 %1210 }
 0x10f   : > { %1252 = vst.msk [vmem:[#allocation3 + $0x38] sm:$0xff] %vm1244_vm9, %v1211_v1  ;;  %836 = vrot.lane.b32.xlu0 %v2688_v3, %s2298_s16 }
 0x110   : > { %838 = vrot.lane.b32.xlu1 %v791_v12, %s2298_s16  ;;  %s2110_s16 = sshll.u32 %s2356_s22, 5  ;;  %s1979_s22 = scalar_lea.sflag [#allocation5], %s223_s30 }
 0x111   : > { %v1338_v18 = vpop.permute.xlu0 %1337  ;;  %s3087_s8 = scalar_lea.hbm %s3135_s5, %s2110_s16 }
 0x112   : > { %1380 = vst.msk [vmem:[#allocation3 + $0x30] sm:$0xff] %vm1373_vm10, %v1338_v18  ;;  %v1340_v20 = vpop.permute.xlu1 %1339 }
 0x113   : > { %1381 = vst.msk [vmem:[#allocation3 + $0x38] sm:$0xff] %vm1373_vm10, %v1340_v20  ;;  %965 = vrot.lane.b32.xlu0 %v1306_v60, %s2299_s17 }
 0x114   : > { %967 = vrot.lane.b32.xlu1 %v920_v16, %s2299_s17  ;;  %s225_s17 = scalar_lea.vmem [#allocation4], %s2083_s6 }
 0x115   : > { %v1467_v22 = vpop.permute.xlu0 %1466 }
 0x116   : > { %1509 = vst.msk [vmem:[#allocation3 + $0x30] sm:$0xff] %vm1502_vm11, %v1467_v22  ;;  %v567_v3 = vpop.permute.xlu1 %566 }
 0x117   : > { %607 = vst.msk [vmem:[#allocation3 + $0x40] sm:$0xff] %vm598_vm4, %v567_v3  ;;  %1094 = vrot.lane.b32.xlu0 %v1435_v5, %s2300_s23 }
 0x118   : > { %1096 = vrot.lane.b32.xlu1 %v1049_v21, %s2300_s23  ;;  %s1995_s23 = sshll.u32 %s225_s17, 4  ;;  %s3089_s23 = int_to_ptr.vmem [resolvable:$true] %s1995_s23 }
 0x119   : > { %v1469_v25 = vpop.permute.xlu0 %1468  ;;  %s2231_s9 = scalar_lea.vmem %s3089_s23, 32 }
 0x11a   : > { %1510 = vst.msk [vmem:[#allocation3 + $0x38] sm:$0xff] %vm1502_vm11, %v1469_v25  ;;  %v569_v27 = vpop.permute.xlu1 %568  ;;  %p2232_p11 = scmp.ne.s32.totalorder %s3089_s23, %s2231_s9 }
 0x11b   : > { %608 = vst.msk [vmem:[#allocation3 + $0x48] sm:$0xff] %vm598_vm4, %v569_v27  ;;  %1224 = vrot.lane.b32.xlu0 %v791_v12, %s2301_s25 }
 0x11c   : > { %1226 = vrot.lane.b32.xlu1 %v1179_v24, %s2301_s25  ;;  %p2233_p12 = pnand %p2232_p11, %p2373_p5 }
 0x11d   : > { %v696_v30 = vpop.permute.xlu0 %695  ;;  %v1525_v31 = vld [vmem:[#allocation3 + $0x30] sm:$0xff] }
 0x11e   : > { %736 = vst.msk [vmem:[#allocation3 + $0x40] sm:$0xff] %vm727_vm5, %v696_v30  ;;  %v698_v34 = vpop.permute.xlu1 %697  ;;  %2152 = vmatprep.mubr.msk.bf16.mxu0 %vm1555_vm12, %v1525_v31  ;;  %p2234_p13 = pneg %p2233_p12 }
 0x11f   : > { %737 = vst.msk [vmem:[#allocation3 + $0x48] sm:$0xff] %vm727_vm5, %v698_v34  ;;  %1353 = vrot.lane.b32.xlu0 %v920_v16, %s2302_s10 }
 0x120   : > { %1355 = vrot.lane.b32.xlu1 %v1308_v28, %s2302_s10  ;;  %s2304_s10 = smov [#allocation4]  }
 0x121   : > { %v825_v37 = vpop.permute.xlu0 %824  ;;  %v1526_v39 = vld [vmem:[#allocation3 + $0x38] sm:$0xff]  ;;  %s2235_s12 = sshll.u32 %s2304_s10, 4  ;;  %s2236_s12 = int_to_ptr.vmem [resolvable:$false] %s2235_s12 }
 0x122   : > { %865 = vst.msk [vmem:[#allocation3 + $0x40] sm:$0xff] %vm856_vm6, %v825_v37  ;;  %v827_v40 = vpop.permute.xlu1 %826  ;;  %2153 = vmatmul.mubr.msk.bf16.gmra.mrb[12].mxu0 %vm1555_vm12, %v1526_v39  ;;  %s2237_s13 = scalar_lea.vmem %s2236_s12, 64  ;;  %p2238_p0 = scmp.lt.s32.totalorder %s3089_s23, %s2236_s12 }
 0x123   : > { %866 = vst.msk [vmem:[#allocation3 + $0x48] sm:$0xff] %vm856_vm6, %v827_v40  ;;  %1482 = vrot.lane.b32.xlu0 %v1049_v21, %s2303_s26  ;;  %p2239_p1 = scmp.lt.s32.totalorder %s2237_s13, %s2231_s9 }
 0x124   : > { %1484 = vrot.lane.b32.xlu1 %v1437_v36, %s2303_s26 }
 0x125   : > { %v954_v29 = vpop.permute.xlu0 %953  ;;  %p2240_p2 = por %p2239_p1, %p2238_p0 }
 0x126   : > { %994 = vst.msk [vmem:[#allocation3 + $0x40] sm:$0xff] %vm985_vm7, %v954_v29  ;;  %v956_v41 = vpop.permute.xlu1 %955 }
 0x127   : > { %995 = vst.msk [vmem:[#allocation3 + $0x48] sm:$0xff] %vm985_vm7, %v956_v41  ;;  %p2241_p3 = pnand %p2240_p2, %p2234_p13 }
 0x129   : > { %v1083_v43 = vpop.permute.xlu0 %1082 }
 0x12a   : > { %1123 = vst.msk [vmem:[#allocation3 + $0x40] sm:$0xff] %vm1114_vm8, %v1083_v43  ;;  %v1085_v44 = vpop.permute.xlu1 %1084 }
 0x12b   : > { %1124 = vst.msk [vmem:[#allocation3 + $0x48] sm:$0xff] %vm1114_vm8, %v1085_v44 }
 0x12d   : > { %v1213_v45 = vpop.permute.xlu0 %1212 }
 0x12e   : > { %1253 = vst.msk [vmem:[#allocation3 + $0x40] sm:$0xff] %vm1244_vm9, %v1213_v45  ;;  %v1215_v46 = vpop.permute.xlu1 %1214 }
 0x12f   : > { %1254 = vst.msk [vmem:[#allocation3 + $0x48] sm:$0xff] %vm1244_vm9, %v1215_v46 }
 0x131   : > { %v1342_v48 = vpop.permute.xlu0 %1341 }
 0x132   : > { %1382 = vst.msk [vmem:[#allocation3 + $0x40] sm:$0xff] %vm1373_vm10, %v1342_v48  ;;  %v1344_v49 = vpop.permute.xlu1 %1343 }
 0x133   : > { %1383 = vst.msk [vmem:[#allocation3 + $0x48] sm:$0xff] %vm1373_vm10, %v1344_v49 }
 0x135   : > { %v1471_v51 = vpop.permute.xlu0 %1470 }
 0x136   : > { %1511 = vst.msk [vmem:[#allocation3 + $0x40] sm:$0xff] %vm1502_vm11, %v1471_v51  ;;  %v571_v53 = vpop.permute.xlu1 %570 }
 0x137   : > { %609 = vst.msk [vmem:[#allocation3 + $0x50] sm:$0xff] %vm598_vm4, %v571_v53 }
 0x139   : > { %v1473_v54 = vpop.permute.xlu0 %1472 }
 0x13a   : > { %1512 = vst.msk [vmem:[#allocation3 + $0x48] sm:$0xff] %vm1502_vm11, %v1473_v54  ;;  %v573_v55 = vpop.permute.xlu1 %572 }
 0x13b   : > { %610 = vst.msk [vmem:[#allocation3 + $0x58] sm:$0xff] %vm598_vm4, %v573_v55 }
 0x13d   : > { %v700_v56 = vpop.permute.xlu0 %699  ;;  %v1527_v32 = vld [vmem:[#allocation3 + $0x40] sm:$0xff] }
 0x13e   : > { %738 = vst.msk [vmem:[#allocation3 + $0x50] sm:$0xff] %vm727_vm5, %v700_v56  ;;  %v702_v47 = vpop.permute.xlu1 %701  ;;  %2156 = vmatprep.mubr.msk.bf16.mxu1 %vm1555_vm12, %v1527_v32 }
 0x13f   : > { %739 = vst.msk [vmem:[#allocation3 + $0x58] sm:$0xff] %vm727_vm5, %v702_v47 }
 0x141   : > { %v829_v57 = vpop.permute.xlu0 %828  ;;  %v1528_v58 = vld [vmem:[#allocation3 + $0x48] sm:$0xff] }
 0x142   : > { %867 = vst.msk [vmem:[#allocation3 + $0x50] sm:$0xff] %vm856_vm6, %v829_v57  ;;  %v831_v59 = vpop.permute.xlu1 %830  ;;  %2157 = vmatmul.mubr.msk.bf16.vlgmr.msra.gmra.mrb[0].mxu1 %vm1555_vm12, %v1528_v58 }
 0x143   : > { %868 = vst.msk [vmem:[#allocation3 + $0x58] sm:$0xff] %vm856_vm6, %v831_v59 }
 0x145   : > { %v958_v60 = vpop.permute.xlu0 %957 }
 0x146   : > { %996 = vst.msk [vmem:[#allocation3 + $0x50] sm:$0xff] %vm985_vm7, %v958_v60  ;;  %v960_v35 = vpop.permute.xlu1 %959 }
 0x147   : > { %997 = vst.msk [vmem:[#allocation3 + $0x58] sm:$0xff] %vm985_vm7, %v960_v35 }
 0x149   : > { %v1087_v61 = vpop.permute.xlu0 %1086 }
 0x14a   : > { %1125 = vst.msk [vmem:[#allocation3 + $0x50] sm:$0xff] %vm1114_vm8, %v1087_v61  ;;  %v1089_v62 = vpop.permute.xlu1 %1088 }
 0x14b   : > { %1126 = vst.msk [vmem:[#allocation3 + $0x58] sm:$0xff] %vm1114_vm8, %v1089_v62 }
 0x14d   : > { %v1217_v63 = vpop.permute.xlu0 %1216 }
 0x14e   : > { %1255 = vst.msk [vmem:[#allocation3 + $0x50] sm:$0xff] %vm1244_vm9, %v1217_v63  ;;  %v1219_v0 = vpop.permute.xlu1 %1218 }
 0x14f   : > { %1256 = vst.msk [vmem:[#allocation3 + $0x58] sm:$0xff] %vm1244_vm9, %v1219_v0 }
 0x151   : > { %v1346_v52 = vpop.permute.xlu0 %1345 }
 0x152   : > { %1384 = vst.msk [vmem:[#allocation3 + $0x50] sm:$0xff] %vm1373_vm10, %v1346_v52  ;;  %v1348_v4 = vpop.permute.xlu1 %1347 }
 0x153   : > { %1385 = vst.msk [vmem:[#allocation3 + $0x58] sm:$0xff] %vm1373_vm10, %v1348_v4 }
 0x155   : > { %v1475_v50 = vpop.permute.xlu0 %1474 }
 0x156   : > { %1513 = vst.msk [vmem:[#allocation3 + $0x50] sm:$0xff] %vm1502_vm11, %v1475_v50  ;;  %v575_v5 = vpop.permute.xlu1 %574 }
 0x157   : > { %611 = vst.msk [vmem:[#allocation3 + $0x60] sm:$0xff] %vm598_vm4, %v575_v5 }
 0x159   : > { %v1477_v6 = vpop.permute.xlu0 %1476 }
 0x15a   : > { %1514 = vst.msk [vmem:[#allocation3 + $0x58] sm:$0xff] %vm1502_vm11, %v1477_v6  ;;  %v577_v7 = vpop.permute.xlu1 %576 }
 0x15b   : > { %612 = vst.msk [vmem:[#allocation3 + $0x68] sm:$0xff] %vm598_vm4, %v577_v7 }
 0x15d   : > { %v704_v8 = vpop.permute.xlu0 %703  ;;  %v1529_v9 = vld [vmem:[#allocation3 + $0x50] sm:$0xff] }
 0x15e   : > { %740 = vst.msk [vmem:[#allocation3 + $0x60] sm:$0xff] %vm727_vm5, %v704_v8  ;;  %v706_v38 = vpop.permute.xlu1 %705  ;;  %2160 = vmatprep.mubr.msk.bf16.mxu1 %vm1555_vm12, %v1529_v9 }
 0x15f   : > { %741 = vst.msk [vmem:[#allocation3 + $0x68] sm:$0xff] %vm727_vm5, %v706_v38 }
 0x161   : > { %v833_v10 = vpop.permute.xlu0 %832  ;;  %v1530_v12 = vld [vmem:[#allocation3 + $0x58] sm:$0xff] }
 0x162   : > { %869 = vst.msk [vmem:[#allocation3 + $0x60] sm:$0xff] %vm856_vm6, %v833_v10  ;;  %v835_v13 = vpop.permute.xlu1 %834  ;;  %2161 = vmatmul.mubr.msk.bf16.gmra.mrb[4].mxu1 %vm1555_vm12, %v1530_v12 }
 0x163   : > { %870 = vst.msk [vmem:[#allocation3 + $0x68] sm:$0xff] %vm856_vm6, %v835_v13 }
 0x165   : > { %v962_v14 = vpop.permute.xlu0 %961 }
 0x166   : > { %998 = vst.msk [vmem:[#allocation3 + $0x60] sm:$0xff] %vm985_vm7, %v962_v14  ;;  %v964_v15 = vpop.permute.xlu1 %963 }
 0x167   : > { %999 = vst.msk [vmem:[#allocation3 + $0x68] sm:$0xff] %vm985_vm7, %v964_v15 }
 0x169   : > { %v1091_v1 = vpop.permute.xlu0 %1090 }
 0x16a   : > { %1127 = vst.msk [vmem:[#allocation3 + $0x60] sm:$0xff] %vm1114_vm8, %v1091_v1  ;;  %v1093_v16 = vpop.permute.xlu1 %1092 }
 0x16b   : > { %1128 = vst.msk [vmem:[#allocation3 + $0x68] sm:$0xff] %vm1114_vm8, %v1093_v16 }
 0x16d   : > { %v1221_v18 = vpop.permute.xlu0 %1220 }
 0x16e   : > { %1257 = vst.msk [vmem:[#allocation3 + $0x60] sm:$0xff] %vm1244_vm9, %v1221_v18  ;;  %v1223_v2 = vpop.permute.xlu1 %1222 }
 0x16f   : > { %1258 = vst.msk [vmem:[#allocation3 + $0x68] sm:$0xff] %vm1244_vm9, %v1223_v2 }
 0x171   : > { %v1350_v19 = vpop.permute.xlu0 %1349 }
 0x172   : > { %1386 = vst.msk [vmem:[#allocation3 + $0x60] sm:$0xff] %vm1373_vm10, %v1350_v19  ;;  %v1352_v20 = vpop.permute.xlu1 %1351 }
 0x173   : > { %1387 = vst.msk [vmem:[#allocation3 + $0x68] sm:$0xff] %vm1373_vm10, %v1352_v20 }
 0x175   : > { %v1479_v21 = vpop.permute.xlu0 %1478 }
 0x176   : > { %1515 = vst.msk [vmem:[#allocation3 + $0x60] sm:$0xff] %vm1502_vm11, %v1479_v21  ;;  %v579_v22 = vpop.permute.xlu1 %578 }
 0x177   : > { %613 = vst.msk [vmem:[#allocation3 + $0x70] sm:$0xff] %vm598_vm4, %v579_v22 }
 0x179   : > { %v1481_v11 = vpop.permute.xlu0 %1480 }
 0x17a   : > { %1516 = vst.msk [vmem:[#allocation3 + $0x68] sm:$0xff] %vm1502_vm11, %v1481_v11  ;;  %v581_v23 = vpop.permute.xlu1 %580 }
 0x17b   : > { %614 = vst.msk [vmem:[#allocation3 + $0x78] sm:$0xff] %vm598_vm4, %v581_v23 }
 0x17d   : > { %v708_v3 = vpop.permute.xlu0 %707  ;;  %v1531_v24 = vld [vmem:[#allocation3 + $0x60] sm:$0xff] }
 0x17e   : > { %742 = vst.msk [vmem:[#allocation3 + $0x70] sm:$0xff] %vm727_vm5, %v708_v3  ;;  %v710_v25 = vpop.permute.xlu1 %709  ;;  %2164 = vmatprep.mubr.msk.bf16.mxu1 %vm1555_vm12, %v1531_v24 }
 0x17f   : > { %743 = vst.msk [vmem:[#allocation3 + $0x78] sm:$0xff] %vm727_vm5, %v710_v25 }
 0x181   : > { %v837_v42 = vpop.permute.xlu0 %836  ;;  %v1532_v26 = vld [vmem:[#allocation3 + $0x68] sm:$0xff] }
 0x182   : > { %871 = vst.msk [vmem:[#allocation3 + $0x70] sm:$0xff] %vm856_vm6, %v837_v42  ;;  %v839_v27 = vpop.permute.xlu1 %838  ;;  %2165 = vmatmul.mubr.msk.bf16.gmra.mrb[8].mxu1 %vm1555_vm12, %v1532_v26 }
 0x183   : > { %872 = vst.msk [vmem:[#allocation3 + $0x78] sm:$0xff] %vm856_vm6, %v839_v27 }
 0x185   : > { %v966_v28 = vpop.permute.xlu0 %965 }
 0x186   : > { %1000 = vst.msk [vmem:[#allocation3 + $0x70] sm:$0xff] %vm985_vm7, %v966_v28  ;;  %v968_v30 = vpop.permute.xlu1 %967 }
 0x187   : > { %1001 = vst.msk [vmem:[#allocation3 + $0x78] sm:$0xff] %vm985_vm7, %v968_v30 }
 0x189   : > { %v1095_v31 = vpop.permute.xlu0 %1094 }
 0x18a   : > { %1129 = vst.msk [vmem:[#allocation3 + $0x70] sm:$0xff] %vm1114_vm8, %v1095_v31  ;;  %v1097_v33 = vpop.permute.xlu1 %1096 }
 0x18b   : > { %1130 = vst.msk [vmem:[#allocation3 + $0x78] sm:$0xff] %vm1114_vm8, %v1097_v33 }
 0x18d   : > { %v1225_v17 = vpop.permute.xlu0 %1224 }
 0x18e   : > { %1259 = vst.msk [vmem:[#allocation3 + $0x70] sm:$0xff] %vm1244_vm9, %v1225_v17  ;;  %v1227_v34 = vpop.permute.xlu1 %1226 }
 0x18f   : > { %1260 = vst.msk [vmem:[#allocation3 + $0x78] sm:$0xff] %vm1244_vm9, %v1227_v34 }
 0x191   : > { %v1354_v36 = vpop.permute.xlu0 %1353 }
 0x192   : > { %1388 = vst.msk [vmem:[#allocation3 + $0x70] sm:$0xff] %vm1373_vm10, %v1354_v36  ;;  %v1356_v37 = vpop.permute.xlu1 %1355 }
 0x193   : > { %1389 = vst.msk [vmem:[#allocation3 + $0x78] sm:$0xff] %vm1373_vm10, %v1356_v37 }
 0x195   : > { %v1483_v39 = vpop.permute.xlu0 %1482  ;;  %v2142_v40 = vpop.f32.mrb[0].mxu0 }
 0x196   : > { %1517 = vst.msk [vmem:[#allocation3 + $0x70] sm:$0xff] %vm1502_vm11, %v1483_v39  ;;  %v1485_v29 = vpop.permute.xlu1 %1484  ;;  %v1642_v41 = vpop.f32.mrb[1].mxu0  ;;  %v1841_v46 = vmul.f32 %v2142_v40, %v2142_v40  ;;  %v1772_v54 = vsel %vm347_vm0, %v2142_v40, 0.0 }
 0x197   : > { %1943 = vst.msk [vmem:[%s2947_s15 + $0x10] sm:$0xff] %vm347_vm0, %v2142_v40  ;;  %v1839_v43 = vmul.f32 %v1642_v41, %v1642_v41  ;;  %1941 = vst.msk [vmem:[%s2947_s15] sm:$0xff] %vm347_vm0, %v1642_v41  ;;  %v2143_v44 = vpop.f32.mrb[2].mxu0  ;;  %v1769_v48 = vsel %vm347_vm0, %v1642_v41, 0.0 }
 0x198   : > { %1518 = vst.msk [vmem:[#allocation3 + $0x78] sm:$0xff] %vm1502_vm11, %v1485_v29  ;;  %v1645_v45 = vpop.f32.mrb[3].mxu0  ;;  %v1842_v56 = vmul.f32 %v2143_v44, %v2143_v44  ;;  %v1874_v58 = vsel %vm347_vm0, %v1841_v46, 0.0  ;;  %v1774_v59 = vsel %vm347_vm0, %v2143_v44, 0.0 }
 0x199   : > { %1944 = vst.msk [vmem:[%s2947_s15 + $0x18] sm:$0xff] %vm347_vm0, %v2143_v44  ;;  %v1770_v49 = vsel %vm347_vm0, %v1645_v45, 0.0  ;;  %v1840_v51 = vmul.f32 %v1645_v45, %v1645_v45  ;;  %1942 = vst.msk [vmem:[%s2947_s15 + $0x8] sm:$0xff] %vm347_vm0, %v1645_v45  ;;  %v1871_v55 = vsel %vm347_vm0, %v1839_v43, 0.0 }
 0x19a   : > { %v1771_v53 = vadd.f32 %v1770_v49, %v1769_v48  ;;  %v1876_v63 = vsel %vm347_vm0, %v1842_v56, 0.0 }
 0x19b   : > { %v1872_v32 = vsel %vm347_vm0, %v1840_v51, 0.0 }
 0x19c   : > { %v1773_v47 = vadd.f32 %v1772_v54, %v1771_v53  ;;  %v1873_v57 = vadd.f32 %v1872_v32, %v1871_v55 }
 0x19d   : > { %v1533_v60 = vld [vmem:[#allocation3 + $0x70] sm:$0xff] }
 0x19e   : > { %v1875_v35 = vadd.f32 %v1874_v58, %v1873_v57  ;;  %2168 = vmatprep.mubr.msk.bf16.mxu1 %vm1555_vm12, %v1533_v60  ;;  %v1775_v62 = vadd.f32 %v1774_v59, %v1773_v47 }
 0x19f   : > { %v1534_v61 = vld [vmem:[#allocation3 + $0x78] sm:$0xff] }
 0x1a0   : > { %2169 = vmatmul.mubr.msk.bf16.gmra.mrb[12].mxu1 %vm1555_vm12, %v1534_v61  ;;  %v1877_v0 = vadd.f32 %v1876_v63, %v1875_v35 }
 0x1b5   : > { %v2146_v52 = vpop.f32.mrb[4].mxu0 }
 0x1b6   : > { %1947 = vst.msk [vmem:[%s2947_s15 + $0x30] sm:$0xff] %vm347_vm0, %v2146_v52  ;;  %v1658_v4 = vpop.f32.mrb[5].mxu0  ;;  %v1845_v9 = vmul.f32 %v2146_v52, %v2146_v52  ;;  %v1780_v15 = vsel %vm347_vm0, %v2146_v52, 0.0 }
 0x1b7   : > { %v1776_v50 = vsel %vm347_vm0, %v1658_v4, 0.0  ;;  %v1843_v5 = vmul.f32 %v1658_v4, %v1658_v4  ;;  %1945 = vst.msk [vmem:[%s2947_s15 + $0x20] sm:$0xff] %vm347_vm0, %v1658_v4  ;;  %v2147_v6 = vpop.f32.mrb[6].mxu0 }
 0x1b8   : > { %v1777_v7 = vadd.f32 %v1776_v50, %v1775_v62  ;;  %1948 = vst.msk [vmem:[%s2947_s15 + $0x38] sm:$0xff] %vm347_vm0, %v2147_v6  ;;  %v1661_v8 = vpop.f32.mrb[7].mxu0  ;;  %v1846_v1 = vmul.f32 %v2147_v6, %v2147_v6  ;;  %v1882_v19 = vsel %vm347_vm0, %v1845_v9, 0.0  ;;  %v1782_v20 = vsel %vm347_vm0, %v2147_v6, 0.0 }
 0x1b9   : > { %v1878_v38 = vsel %vm347_vm0, %v1843_v5, 0.0  ;;  %v1778_v10 = vsel %vm347_vm0, %v1661_v8, 0.0  ;;  %v1844_v12 = vmul.f32 %v1661_v8, %v1661_v8  ;;  %1946 = vst.msk [vmem:[%s2947_s15 + $0x28] sm:$0xff] %vm347_vm0, %v1661_v8 }
 0x1ba   : > { %v1879_v13 = vadd.f32 %v1878_v38, %v1877_v0  ;;  %v1779_v14 = vadd.f32 %v1778_v10, %v1777_v7  ;;  %v1884_v11 = vsel %vm347_vm0, %v1846_v1, 0.0 }
 0x1bb   : > { %v1880_v16 = vsel %vm347_vm0, %v1844_v12, 0.0 }
 0x1bc   : > { %v1781_v18 = vadd.f32 %v1780_v15, %v1779_v14  ;;  %v1881_v2 = vadd.f32 %v1880_v16, %v1879_v13 }
 0x1be   : > { %v1883_v21 = vadd.f32 %v1882_v19, %v1881_v2  ;;  %v1783_v22 = vadd.f32 %v1782_v20, %v1781_v18 }
 0x1c0   : > { %v1885_v23 = vadd.f32 %v1884_v11, %v1883_v21 }
 0x1d5   : > { %v2150_v3 = vpop.f32.mrb[8].mxu0 }
 0x1d6   : > { %1951 = vst.msk [vmem:[%s2947_s15 + $0x50] sm:$0xff] %vm347_vm0, %v2150_v3  ;;  %v1674_v24 = vpop.f32.mrb[9].mxu0  ;;  %v1849_v30 = vmul.f32 %v2150_v3, %v2150_v3  ;;  %v1788_v37 = vsel %vm347_vm0, %v2150_v3, 0.0 }
 0x1d7   : > { %v1784_v25 = vsel %vm347_vm0, %v1674_v24, 0.0  ;;  %v1847_v42 = vmul.f32 %v1674_v24, %v1674_v24  ;;  %1949 = vst.msk [vmem:[%s2947_s15 + $0x40] sm:$0xff] %vm347_vm0, %v1674_v24  ;;  %v2151_v26 = vpop.f32.mrb[10].mxu0 }
 0x1d8   : > { %v1785_v27 = vadd.f32 %v1784_v25, %v1783_v22  ;;  %1952 = vst.msk [vmem:[%s2947_s15 + $0x58] sm:$0xff] %vm347_vm0, %v2151_v26  ;;  %v1677_v28 = vpop.f32.mrb[11].mxu0  ;;  %v1850_v39 = vmul.f32 %v2151_v26, %v2151_v26  ;;  %v1890_v43 = vsel %vm347_vm0, %v1849_v30, 0.0  ;;  %v1790_v44 = vsel %vm347_vm0, %v2151_v26, 0.0 }
 0x1d9   : > { %v1886_v31 = vsel %vm347_vm0, %v1847_v42, 0.0  ;;  %v1786_v33 = vsel %vm347_vm0, %v1677_v28, 0.0  ;;  %v1848_v17 = vmul.f32 %v1677_v28, %v1677_v28  ;;  %1950 = vst.msk [vmem:[%s2947_s15 + $0x48] sm:$0xff] %vm347_vm0, %v1677_v28 }
 0x1da   : > { %v1887_v34 = vadd.f32 %v1886_v31, %v1885_v23  ;;  %v1787_v36 = vadd.f32 %v1786_v33, %v1785_v27  ;;  %v1892_v48 = vsel %vm347_vm0, %v1850_v39, 0.0 }
 0x1db   : > { %v1888_v40 = vsel %vm347_vm0, %v1848_v17, 0.0 }
 0x1dc   : > { %v1789_v29 = vadd.f32 %v1788_v37, %v1787_v36  ;;  %v1889_v41 = vadd.f32 %v1888_v40, %v1887_v34 }
 0x1de   : > { %v1891_v45 = vadd.f32 %v1890_v43, %v1889_v41  ;;  %v1791_v46 = vadd.f32 %v1790_v44, %v1789_v29 }
 0x1e0   : > { %v1893_v49 = vadd.f32 %v1892_v48, %v1891_v45 }
 0x1f5   : > { %v2154_v51 = vpop.f32.mrb[12].mxu0 }
 0x1f6   : > { %1955 = vst.msk [vmem:[%s2947_s15 + $0x70] sm:$0xff] %vm347_vm0, %v2154_v51  ;;  %v1690_v53 = vpop.f32.mrb[13].mxu0  ;;  %v1853_v57 = vmul.f32 %v2154_v51, %v2154_v51  ;;  %v1796_v62 = vsel %vm347_vm0, %v2154_v51, 0.0 }
 0x1f7   : > { %v1792_v54 = vsel %vm347_vm0, %v1690_v53, 0.0  ;;  %v1851_v55 = vmul.f32 %v1690_v53, %v1690_v53  ;;  %1953 = vst.msk [vmem:[%s2947_s15 + $0x60] sm:$0xff] %vm347_vm0, %v1690_v53  ;;  %v2155_v56 = vpop.f32.mrb[14].mxu0 }
 0x1f8   : > { %v1793_v32 = vadd.f32 %v1792_v54, %v1791_v46  ;;  %1956 = vst.msk [vmem:[%s2947_s15 + $0x78] sm:$0xff] %vm347_vm0, %v2155_v56  ;;  %v1693_v47 = vpop.f32.mrb[15].mxu0  ;;  %v1854_v63 = vmul.f32 %v2155_v56, %v2155_v56  ;;  %v1898_v50 = vsel %vm347_vm0, %v1853_v57, 0.0  ;;  %v1798_v5 = vsel %vm347_vm0, %v2155_v56, 0.0 }
 0x1f9   : > { %v1894_v58 = vsel %vm347_vm0, %v1851_v55, 0.0  ;;  %v1794_v59 = vsel %vm347_vm0, %v1693_v47, 0.0  ;;  %v1852_v60 = vmul.f32 %v1693_v47, %v1693_v47  ;;  %1954 = vst.msk [vmem:[%s2947_s15 + $0x68] sm:$0xff] %vm347_vm0, %v1693_v47 }
 0x1fa   : > { %v1895_v35 = vadd.f32 %v1894_v58, %v1893_v49  ;;  %v1795_v61 = vadd.f32 %v1794_v59, %v1793_v32  ;;  %v1900_v8 = vsel %vm347_vm0, %v1854_v63, 0.0 }
 0x1fb   : > { %v1896_v0 = vsel %vm347_vm0, %v1852_v60, 0.0 }
 0x1fc   : > { %v1797_v52 = vadd.f32 %v1796_v62, %v1795_v61  ;;  %v1897_v4 = vadd.f32 %v1896_v0, %v1895_v35 }
 0x1fe   : > { %v1899_v6 = vadd.f32 %v1898_v50, %v1897_v4  ;;  %v1799_v7 = vadd.f32 %v1798_v5, %v1797_v52 }
 0x200   : > { %v1901_v9 = vadd.f32 %v1900_v8, %v1899_v6 }
 0x215   : > { %v2158_v38 = vpop.f32.mrb[0].mxu1 }
 0x216   : > { %1959 = vst.msk [vmem:[%s2947_s15 + $0x90] sm:$0xff] %vm347_vm0, %v2158_v38  ;;  %v1706_v10 = vpop.f32.mrb[1].mxu1  ;;  %v1857_v16 = vmul.f32 %v2158_v38, %v2158_v38  ;;  %v1804_v22 = vsel %vm347_vm0, %v2158_v38, 0.0 }
 0x217   : > { %v1800_v12 = vsel %vm347_vm0, %v1706_v10, 0.0  ;;  %v1855_v13 = vmul.f32 %v1706_v10, %v1706_v10  ;;  %1957 = vst.msk [vmem:[%s2947_s15 + $0x80] sm:$0xff] %vm347_vm0, %v1706_v10  ;;  %v2159_v14 = vpop.f32.mrb[2].mxu1 }
 0x218   : > { %v1801_v15 = vadd.f32 %v1800_v12, %v1799_v7  ;;  %1960 = vst.msk [vmem:[%s2947_s15 + $0x98] sm:$0xff] %vm347_vm0, %v2159_v14  ;;  %v1709_v1 = vpop.f32.mrb[3].mxu1  ;;  %v1858_v11 = vmul.f32 %v2159_v14, %v2159_v14  ;;  %v1906_v25 = vsel %vm347_vm0, %v1857_v16, 0.0  ;;  %v1806_v42 = vsel %vm347_vm0, %v2159_v14, 0.0 }
 0x219   : > { %v1902_v18 = vsel %vm347_vm0, %v1855_v13, 0.0  ;;  %v1802_v2 = vsel %vm347_vm0, %v1709_v1, 0.0  ;;  %v1856_v19 = vmul.f32 %v1709_v1, %v1709_v1  ;;  %1958 = vst.msk [vmem:[%s2947_s15 + $0x88] sm:$0xff] %vm347_vm0, %v1709_v1 }
 0x21a   : > { %v1903_v20 = vadd.f32 %v1902_v18, %v1901_v9  ;;  %v1803_v21 = vadd.f32 %v1802_v2, %v1801_v15  ;;  %v1908_v28 = vsel %vm347_vm0, %v1858_v11, 0.0 }
 0x21b   : > { %v1904_v23 = vsel %vm347_vm0, %v1856_v19, 0.0 }
 0x21c   : > { %v1805_v3 = vadd.f32 %v1804_v22, %v1803_v21  ;;  %v1905_v24 = vadd.f32 %v1904_v23, %v1903_v20 }
 0x21e   : > { %v1907_v26 = vadd.f32 %v1906_v25, %v1905_v24  ;;  %v1807_v27 = vadd.f32 %v1806_v42, %v1805_v3 }
 0x220   : > { %v1909_v30 = vadd.f32 %v1908_v28, %v1907_v26 }
 0x235   : > { %v2162_v31 = vpop.f32.mrb[4].mxu1 }
 0x236   : > { %1963 = vst.msk [vmem:[%s2947_s15 + $0xb0] sm:$0xff] %vm347_vm0, %v2162_v31  ;;  %v1722_v33 = vpop.f32.mrb[5].mxu1  ;;  %v1861_v40 = vmul.f32 %v2162_v31, %v2162_v31  ;;  %v1812_v46 = vsel %vm347_vm0, %v2162_v31, 0.0 }
 0x237   : > { %v1808_v17 = vsel %vm347_vm0, %v1722_v33, 0.0  ;;  %v1859_v34 = vmul.f32 %v1722_v33, %v1722_v33  ;;  %1961 = vst.msk [vmem:[%s2947_s15 + $0xa0] sm:$0xff] %vm347_vm0, %v1722_v33  ;;  %v2163_v36 = vpop.f32.mrb[6].mxu1 }
 0x238   : > { %v1809_v37 = vadd.f32 %v1808_v17, %v1807_v27  ;;  %1964 = vst.msk [vmem:[%s2947_s15 + $0xb8] sm:$0xff] %vm347_vm0, %v2163_v36  ;;  %v1725_v39 = vpop.f32.mrb[7].mxu1  ;;  %v1862_v48 = vmul.f32 %v2163_v36, %v2163_v36  ;;  %v1914_v54 = vsel %vm347_vm0, %v1861_v40, 0.0  ;;  %v1814_v55 = vsel %vm347_vm0, %v2163_v36, 0.0 }
 0x239   : > { %v1910_v29 = vsel %vm347_vm0, %v1859_v34, 0.0  ;;  %v1810_v41 = vsel %vm347_vm0, %v1725_v39, 0.0  ;;  %v1860_v43 = vmul.f32 %v1725_v39, %v1725_v39  ;;  %1962 = vst.msk [vmem:[%s2947_s15 + $0xa8] sm:$0xff] %vm347_vm0, %v1725_v39 }
 0x23a   : > { %v1911_v44 = vadd.f32 %v1910_v29, %v1909_v30  ;;  %v1811_v45 = vadd.f32 %v1810_v41, %v1809_v37  ;;  %v1916_v47 = vsel %vm347_vm0, %v1862_v48, 0.0 }
 0x23b   : > { %v1912_v49 = vsel %vm347_vm0, %v1860_v43, 0.0 }
 0x23c   : > { %v1813_v51 = vadd.f32 %v1812_v46, %v1811_v45  ;;  %v1913_v53 = vadd.f32 %v1912_v49, %v1911_v44 }
 0x23e   : > { %v1915_v56 = vadd.f32 %v1914_v54, %v1913_v53  ;;  %v1815_v32 = vadd.f32 %v1814_v55, %v1813_v51 }
 0x240   : > { %v1917_v57 = vadd.f32 %v1916_v47, %v1915_v56 }
 0x255   : > { %v2166_v58 = vpop.f32.mrb[8].mxu1 }
 0x256   : > { %1967 = vst.msk [vmem:[%s2947_s15 + $0xd0] sm:$0xff] %vm347_vm0, %v2166_v58  ;;  %v1738_v59 = vpop.f32.mrb[9].mxu1  ;;  %v1865_v0 = vmul.f32 %v2166_v58, %v2166_v58  ;;  %v1820_v7 = vsel %vm347_vm0, %v2166_v58, 0.0 }
 0x257   : > { %v1816_v60 = vsel %vm347_vm0, %v1738_v59, 0.0  ;;  %v1863_v35 = vmul.f32 %v1738_v59, %v1738_v59  ;;  %1965 = vst.msk [vmem:[%s2947_s15 + $0xc0] sm:$0xff] %vm347_vm0, %v1738_v59  ;;  %v2167_v61 = vpop.f32.mrb[10].mxu1 }
 0x258   : > { %v1817_v62 = vadd.f32 %v1816_v60, %v1815_v32  ;;  %1968 = vst.msk [vmem:[%s2947_s15 + $0xd8] sm:$0xff] %vm347_vm0, %v2167_v61  ;;  %v1741_v63 = vpop.f32.mrb[11].mxu1  ;;  %v1866_v8 = vmul.f32 %v2167_v61, %v2167_v61  ;;  %v1922_v12 = vsel %vm347_vm0, %v1865_v0, 0.0  ;;  %v1822_v13 = vsel %vm347_vm0, %v2167_v61, 0.0 }
 0x259   : > { %v1918_v52 = vsel %vm347_vm0, %v1863_v35, 0.0  ;;  %v1818_v4 = vsel %vm347_vm0, %v1741_v63, 0.0  ;;  %v1864_v50 = vmul.f32 %v1741_v63, %v1741_v63  ;;  %1966 = vst.msk [vmem:[%s2947_s15 + $0xc8] sm:$0xff] %vm347_vm0, %v1741_v63 }
 0x25a   : > { %v1919_v5 = vadd.f32 %v1918_v52, %v1917_v57  ;;  %v1819_v6 = vadd.f32 %v1818_v4, %v1817_v62  ;;  %v1924_v1 = vsel %vm347_vm0, %v1866_v8, 0.0 }
 0x25b   : > { %v1920_v9 = vsel %vm347_vm0, %v1864_v50, 0.0 }
 0x25c   : > { %v1821_v38 = vadd.f32 %v1820_v7, %v1819_v6  ;;  %v1921_v10 = vadd.f32 %v1920_v9, %v1919_v5 }
 0x25e   : > { %v1923_v14 = vadd.f32 %v1922_v12, %v1921_v10  ;;  %v1823_v15 = vadd.f32 %v1822_v13, %v1821_v38 }
 0x260   : > { %v1925_v16 = vadd.f32 %v1924_v1, %v1923_v14 }
 0x273   : > { %v2170_v18 = vpop.f32.mrb[12].mxu1 }
 0x274   : > { %1971 = vst.msk [vmem:[%s2947_s15 + $0xf0] sm:$0xff] %vm347_vm0, %v2170_v18  ;;  %v1754_v2 = vpop.f32.mrb[13].mxu1  ;;  %v1869_v23 = vmul.f32 %v2170_v18, %v2170_v18  ;;  %v1828_v27 = vsel %vm347_vm0, %v2170_v18, 0.0 }
 0x275   : > { %v1824_v19 = vsel %vm347_vm0, %v1754_v2, 0.0  ;;  %v1867_v20 = vmul.f32 %v1754_v2, %v1754_v2  ;;  %1969 = vst.msk [vmem:[%s2947_s15 + $0xe0] sm:$0xff] %vm347_vm0, %v1754_v2  ;;  %v2171_v21 = vpop.f32.mrb[14].mxu1 }
 0x276   : > { %v1825_v22 = vadd.f32 %v1824_v19, %v1823_v15  ;;  %1972 = vst.msk [vmem:[%s2947_s15 + $0xf8] sm:$0xff] %vm347_vm0, %v2171_v21  ;;  %v1757_v11 = vpop.f32.mrb[15].mxu1  ;;  %v1870_v28 = vmul.f32 %v2171_v21, %v2171_v21  ;;  %v1930_v17 = vsel %vm347_vm0, %v1869_v23, 0.0  ;;  %v1830_v34 = vsel %vm347_vm0, %v2171_v21, 0.0 }
 0x277   : > { %v1926_v3 = vsel %vm347_vm0, %v1867_v20, 0.0  ;;  %v1826_v24 = vsel %vm347_vm0, %v1757_v11, 0.0  ;;  %v1868_v25 = vmul.f32 %v1757_v11, %v1757_v11  ;;  %1970 = vst.msk [vmem:[%s2947_s15 + $0xe8] sm:$0xff] %vm347_vm0, %v1757_v11 }
 0x278   : > { %v1927_v42 = vadd.f32 %v1926_v3, %v1925_v16  ;;  %v1827_v26 = vadd.f32 %v1826_v24, %v1825_v22  ;;  %v1932_v39 = vsel %vm347_vm0, %v1870_v28, 0.0 }
 0x279   : > { %v1928_v30 = vsel %vm347_vm0, %v1868_v25, 0.0 }
 0x27a   : > { %v1829_v31 = vadd.f32 %v1828_v27, %v1827_v26  ;;  %v1929_v33 = vadd.f32 %v1928_v30, %v1927_v42 }
 0x27c   : > { %v1831_v36 = vadd.f32 %v1830_v34, %v1829_v31  ;;  %v1931_v37 = vadd.f32 %v1930_v17, %v1929_v33 }
 0x27e   : > { %v1832_v40 = vrot.slane %v1831_v36, 4  ;;  %v1933_v29 = vadd.f32 %v1932_v39, %v1931_v37 }
 0x280   : > { %v1833_v41 = vadd.f32 %v1832_v40, %v1831_v36  ;;  %v1934_v43 = vrot.slane %v1933_v29, 4 }
 0x282   : > { %v1834_v44 = vrot.slane %v1833_v41, 2  ;;  %v1935_v45 = vadd.f32 %v1934_v43, %v1933_v29 }
 0x284   : > { %v1835_v46 = vadd.f32 %v1834_v44, %v1833_v41  ;;  %v1936_v48 = vrot.slane %v1935_v45, 2 }
 0x286   : > { %v1836_v49 = vrot.slane %v1835_v46, 1  ;;  %v1937_v51 = vadd.f32 %v1936_v48, %v1935_v45 }
 0x288   : > { %v1837_v53 = vadd.f32 %v1836_v49, %v1835_v46  ;;  %v1938_v54 = vrot.slane %v1937_v51, 1 }
 0x28a   : > { %1838 = vst.msk [vmem:[%s225_s17] sm:$0x1] %vm357_vm2, %v1837_v53  ;;  %v1939_v55 = vadd.f32 %v1938_v54, %v1937_v51 }
 0x28c   : > { %1940 = vst.msk [vmem:[%s225_s17 + $0x1] sm:$0x1] %vm357_vm2, %v1939_v55 }
 0x28d   : > { %2244 = shalt.err (!%p2241_p3)
}
 0x28e   : > { %s2245_s26 = scalar_lea.hbm %s3087_s8, 32  ;;  %s2249_s15 = scalar_lea.hbm %s3135_s5, 64 }
 0x28f   : > { %p2246_p4 = scmp.ne.s32.totalorder %s3087_s8, %s2245_s26  ;;  %p2250_p9 = scmp.lt.u32.totalorder %s3087_s8, %s3135_s5 }
 0x290   : > { %p2251_p10 = scmp.lt.u32.totalorder %s2249_s15, %s2245_s26  ;;  %p2253_p12 = scmp.lt.u32.totalorder %s2245_s26, %s3087_s8 }
 0x291   : > { %p2247_p7 = pnand %p2246_p4, %p2373_p5 }
 0x292   : > { %p2252_p11 = por %p2251_p10, %p2250_p9 }
 0x293   : > { %p2248_p8 = pneg %p2247_p7 }
 0x294   : > { %p2254_p13 = por %p2253_p12, %p2252_p11 }
 0x296   : > { %p2255_p0 = pnand %p2254_p13, %p2248_p8 }
 0x298   : > { %2258 = shalt.err (!%p2255_p0)
}
 0x299   : > { %2180 = dma.vmem_to_hbm [thread:$0]  (%p2373_p5), %s3089_s23, 32, %s3087_s8, %s1979_s22  }
 0x29a PF: > { %p2186_p1 = scmp.ge.s32.totalorder %s2293_s21, 2  ;;  %s2015_s16 = sand.u32 1, %s2281_s18  }
 0x29b   : > { %s2016_s17 = scalar_lea.sflag [#allocation5], %s2015_s16 }
 0x29c   : > { %p2183_p2 = pnand %p2186_p1, %p2377_p6 }
 0x29e   : > { %2276 = dma.done.wait (!%p2183_p2), %s2016_s17, 32  }
 0x29f   : > { %2278 = vsyncadd (!%p2183_p2), %s2016_s17, 4294967264  ;;  %p16_p3 = scmp.ge.s32.totalorder %s2360_s24, 4   ;;  %s3138_s18 = smov %s2285_s19 }
 0x2a0   : > { %s3139_s19 = smov %s2289_s20  ;;  %s3140_s20 = smov %s2371_s27 }
 0x2a1   : > { %s3141_s21 = smov %s2360_s24  ;;  %18 = sbr.rel (!%p16_p3) target bundleno = 3 (0x3), region = 86 }
 0x2a8   :  { %2021 = vsyncpa [#allocation5], 1 }
 0x2a9   :  { %2023 = vsyncpa [#allocation5 + $0x1], 1 }

</bundles_post_ra>
